<compile_context>
chip_gen: v7x
topology: tpu7x:2x2x1
jax: 0.10.0
libtpu: 0.0.40
codegen_flags: <defaults>
</compile_context>

<pallas_src>
import functools

import jax
import jax.numpy as jnp
from jax.experimental import pallas as pl
from jax.experimental.pallas import tpu as pltpu


def _round_up(x, m):
    return ((x + m - 1) // m) * m


# ----------------------------------------------------------------------------
# Pallas kernel 1 (frontend): down_l / down_h 1x1 convs + fused bilinear
# upsample.  Grid over batch; bf16 operands, f32 accumulation, bf16 outputs.
# ----------------------------------------------------------------------------
def _frontend_kernel(wdl_ref, wdh_ref, rsz_ref, low_ref, high_ref,
                     lfeat_ref, hup_ref):
    # l_feature = W_down_l @ low[b]                         -> (Cout, P)
    lfeat_ref[...] = jnp.dot(
        wdl_ref[...], low_ref[...],
        preferred_element_type=jnp.float32).astype(lfeat_ref.dtype)
    # h_down = W_down_h @ high[b]                           -> (Cout, Ph)
    h_down = jnp.dot(wdh_ref[...], high_ref[...],
                     preferred_element_type=jnp.float32).astype(jnp.bfloat16)
    # align_corners bilinear upsample fused as one matmul against the shared
    # (Ph, P) operator kron(Ah, Aw).
    # TODO(synk): at very large resolutions switch to the separable Aw/Ah form.
    hup_ref[...] = jnp.dot(
        h_down, rsz_ref[...],
        preferred_element_type=jnp.float32).astype(hup_ref.dtype)


# ----------------------------------------------------------------------------
# Pallas kernel 2 (backend): flow conv + gate conv + both grid_sample warps
# + gated blend.  Grid over (batch, pixel tiles), both "parallel".
# ----------------------------------------------------------------------------
def _axis_onehot(coord, weight, n_axis):
    """(n_axis, tp) selector: one-hot of integer-valued coord (1, tp) scaled
    by weight, zeroed where coord is outside [0, n_axis-1] (zeros padding)."""
    valid = (coord >= 0.0) & (coord <= n_axis - 1.0)
    idx = jnp.clip(coord, 0.0, n_axis - 1.0).astype(jnp.int32)        # (1, tp)
    iota = jax.lax.broadcasted_iota(jnp.int32, (n_axis, coord.shape[-1]), 0)
    return (iota == idx).astype(jnp.float32) * (weight * valid.astype(jnp.float32))


def _gather_matrix(ix, iy, hin, win):
    """Factorized bilinear grid_sample gather matrix, (Hin*Win, tp) bf16."""
    ix0 = jnp.floor(ix)
    iy0 = jnp.floor(iy)
    wx1 = ix - ix0
    wy1 = iy - iy0
    xmat = (_axis_onehot(ix0, 1.0 - wx1, win) +
            _axis_onehot(ix0 + 1.0, wx1, win))                        # (Win, tp)
    ymat = (_axis_onehot(iy0, 1.0 - wy1, hin) +
            _axis_onehot(iy0 + 1.0, wy1, hin))                        # (Hin, tp)
    tp = xmat.shape[-1]
    gmat = (ymat[:, None, :] * xmat[None, :, :]).reshape(hin * win, tp)
    return gmat.astype(jnp.bfloat16)


def _fused_flow_kernel(wfl_ref, wga_ref, base_ref, fp_ref, gp_ref,
                       horig_ref, low_ref, o_ref, *, h_hi, w_hi, h_lo, w_lo):
    # flow_make: 3x3 conv as matmul over im2col patches (rows 0..3 are real)
    flow = jnp.dot(wfl_ref[...], fp_ref[...],
                   preferred_element_type=jnp.float32)                # (8, tp)
    # flow_gate: 3x3 conv + sigmoid (row 0 is the real output channel)
    gate = jax.nn.sigmoid(
        jnp.dot(wga_ref[...], gp_ref[...],
                preferred_element_type=jnp.float32)[0:1, :])          # (1, tp)

    base = base_ref[...]                                              # (4, tp)
    # grid = base_norm + flow / (out_w, out_h), unnormalized with
    # align_corners=True  ->  per-axis linear scale on the flow.
    sxh = 0.5 * (w_hi - 1) / w_lo
    syh = 0.5 * (h_hi - 1) / h_lo
    sxl = 0.5 * (w_lo - 1) / w_lo
    syl = 0.5 * (h_lo - 1) / h_lo

    # warp of the ORIGINAL high-level feature with flow_up (channels 0, 1)
    gmat_h = _gather_matrix(base[0:1, :] + flow[0:1, :] * sxh,
                            base[1:2, :] + flow[1:2, :] * syh, h_hi, w_hi)
    h_warp = jnp.dot(horig_ref[...], gmat_h,
                     preferred_element_type=jnp.float32)              # (Cin, tp)

    # warp of the ORIGINAL low-level feature with flow_down (channels 2, 3)
    gmat_l = _gather_matrix(base[2:3, :] + flow[2:3, :] * sxl,
                            base[3:4, :] + flow[3:4, :] * syl, h_lo, w_lo)
    l_warp = jnp.dot(low_ref[...], gmat_l,
                     preferred_element_type=jnp.float32)              # (Cin, tp)

    # gated blend: one mul + adds instead of two muls
    o_ref[...] = l_warp + gate * (h_warp - l_warp)


# ----------------------------------------------------------------------------
# Plain-JAX glue (layouts, im2col, channel stats, constant operators)
# ----------------------------------------------------------------------------
def _interp_matrix(n_in, n_out):
    """1-D align_corners=True bilinear operator, shape (n_in, n_out)."""
    if n_in == 1:
        return jnp.ones((1, n_out), jnp.float32)
    src = jnp.arange(n_out, dtype=jnp.float32) * (n_in - 1) / max(n_out - 1, 1)
    i0 = jnp.floor(src)
    w1 = src - i0
    i0c = jnp.clip(i0, 0, n_in - 1).astype(jnp.int32)
    i1c = jnp.clip(i0 + 1, 0, n_in - 1).astype(jnp.int32)
    m = (jax.nn.one_hot(i0c, n_in, dtype=jnp.float32) * (1.0 - w1)[:, None] +
         jax.nn.one_hot(i1c, n_in, dtype=jnp.float32) * w1[:, None])
    return m.T


def _im2col3x3(x_nchw):
    """(N, C, H, W) -> (N, C*9, H*W), zero padded; ordering matches
    torch Conv2d weight.reshape(Cout, Cin*9)."""
    n, c, h, w = x_nchw.shape
    xp = jnp.pad(x_nchw, ((0, 0), (0, 0), (1, 1), (1, 1)))
    cols = [xp[:, :, i:i + h, j:j + w] for i in range(3) for j in range(3)]
    patches = jnp.stack(cols, axis=2)                  # (N, C, 9, H, W)
    return patches.reshape(n, c * 9, h * w)


def build_module(key, inplane, outplane, h_lo, w_lo, h_hi, w_hi):
    """Deterministic synthetic weights + precomputed constant operators."""
    k1, k2, k3, k4 = jax.random.split(key, 4)

    def conv_w(k, shape):
        fan_in = shape[1] * shape[2] * shape[3]
        return jax.random.normal(k, shape, jnp.float32) * (1.0 / fan_in) ** 0.5

    w_down_h = conv_w(k1, (outplane, inplane, 1, 1))
    w_down_l = conv_w(k2, (outplane, inplane, 1, 1))
    w_flow = conv_w(k3, (4, outplane * 2, 3, 3))
    w_gate = conv_w(k4, (1, 4, 3, 3))

    kf = _round_up(outplane * 2 * 9, 16)
    kg = _round_up(4 * 9, 16)

    def pad2(m, rows, cols):
        return jnp.pad(m, ((0, rows - m.shape[0]), (0, cols - m.shape[1])))

    prm = dict(
        wdl=w_down_l.reshape(outplane, inplane).astype(jnp.bfloat16),
        wdh=w_down_h.reshape(outplane, inplane).astype(jnp.bfloat16),
        wfl=pad2(w_flow.reshape(4, -1), 8, kf).astype(jnp.bfloat16),
        wga=pad2(w_gate.reshape(1, -1), 8, kg).astype(jnp.bfloat16),
        # shared (Ph, P) bilinear operator (bf16; no kron(eye(N)) block-diag)
        rsz=jnp.kron(_interp_matrix(h_hi, h_lo),
                     _interp_matrix(w_hi, w_lo)).astype(jnp.bfloat16),
    )

    # unnormalized base sampling coordinates for both grid_sample calls
    gx = jnp.broadcast_to(jnp.arange(w_lo, dtype=jnp.float32)[None, :]
                          / max(w_lo - 1, 1), (h_lo, w_lo)).reshape(-1)
    gy = jnp.broadcast_to(jnp.arange(h_lo, dtype=jnp.float32)[:, None]
                          / max(h_lo - 1, 1), (h_lo, w_lo)).reshape(-1)
    prm['base'] = jnp.stack([gx * (w_hi - 1), gy * (h_hi - 1),
                             gx * (w_lo - 1), gy * (h_lo - 1)], axis=0)
    return prm


def aligned_module_v2_forward(low, high, prm):
    """AlignedModuleV2PoolingAttention.forward((low_feature, h_feature))."""
    n, c_in, h_lo, w_lo = low.shape
    _, _, h_hi, w_hi = high.shape
    p = h_lo * w_lo
    ph = h_hi * w_hi
    c_out = prm['wdl'].shape[0]
    kf = prm['wfl'].shape[1]
    kg = prm['wga'].shape[1]
    vmem_cap = 64 * 1024 * 1024

    # ---- Pallas call 1: 1x1 convs + fused bilinear upsample (grid over N) ---
    low_b = low.reshape(n, c_in, p).astype(jnp.bfloat16)
    high_b = high.reshape(n, c_in, ph).astype(jnp.bfloat16)
    l_feat, h_up = pl.pallas_call(
        _frontend_kernel,
        grid=(n,),
        in_specs=[
            pl.BlockSpec((c_out, c_in), lambda b: (0, 0)),
            pl.BlockSpec((c_out, c_in), lambda b: (0, 0)),
            pl.BlockSpec((ph, p), lambda b: (0, 0)),
            pl.BlockSpec((None, c_in, p), lambda b: (b, 0, 0)),
            pl.BlockSpec((None, c_in, ph), lambda b: (b, 0, 0)),
        ],
        out_specs=(
            pl.BlockSpec((None, c_out, p), lambda b: (b, 0, 0)),
            pl.BlockSpec((None, c_out, p), lambda b: (b, 0, 0)),
        ),
        out_shape=(jax.ShapeDtypeStruct((n, c_out, p), jnp.bfloat16),
                   jax.ShapeDtypeStruct((n, c_out, p), jnp.bfloat16)),
        compiler_params=pltpu.CompilerParams(
            dimension_semantics=("parallel",),
            vmem_limit_bytes=vmem_cap),
    )(prm['wdl'], prm['wdh'], prm['rsz'], low_b, high_b)

    # ---- glue: im2col patches and channel mean/max statistics ---------------
    # TODO(synk): 3x3 im2col extraction and channel mean/max reductions are
    # tiny plain-JAX (XLA) glue ops; not worth extra pallas_call launches.
    h_up_nchw = h_up.reshape(n, c_out, h_lo, w_lo)
    l_feat_nchw = l_feat.reshape(n, c_out, h_lo, w_lo)
    cat_nchw = jnp.concatenate([h_up_nchw, l_feat_nchw], axis=1)  # (N,2Cout,H,W)
    flow_patches = _im2col3x3(cat_nchw)                           # (N,2Cout*9,P)
    flow_patches = jnp.pad(
        flow_patches, ((0, 0), (0, kf - flow_patches.shape[1]), (0, 0))
    ).astype(jnp.bfloat16)

    h_up_f32 = h_up_nchw.astype(jnp.float32)
    stats = jnp.stack([jnp.mean(h_up_f32, axis=1),
                       jnp.mean(low, axis=1),
                       jnp.max(h_up_f32, axis=1),
                       jnp.max(low, axis=1)], axis=1)             # (N, 4, H, W)
    gate_patches = _im2col3x3(stats)                              # (N, 36, P)
    gate_patches = jnp.pad(
        gate_patches, ((0, 0), (0, kg - gate_patches.shape[1]), (0, 0))
    ).astype(jnp.bfloat16)

    # ---- Pallas call 2: flow + gate convs + warps + blend, grid (N, tiles) --
    tp = 128 if p % 128 == 0 else p   # TODO(synk): sweep tile size / Buffered depth for production shapes
    nt = p // tp

    kernel = functools.partial(_fused_flow_kernel,
                               h_hi=h_hi, w_hi=w_hi, h_lo=h_lo, w_lo=w_lo)
    fused = pl.pallas_call(
        kernel,
        grid=(n, nt),
        in_specs=[
            pl.BlockSpec((8, kf), lambda b, j: (0, 0)),
            pl.BlockSpec((8, kg), lambda b, j: (0, 0)),
            pl.BlockSpec((4, tp), lambda b, j: (0, j)),
            pl.BlockSpec((None, kf, tp), lambda b, j: (b, 0, j)),
            pl.BlockSpec((None, kg, tp), lambda b, j: (b, 0, j)),
            pl.BlockSpec((None, c_in, ph), lambda b, j: (b, 0, 0)),
            pl.BlockSpec((None, c_in, p), lambda b, j: (b, 0, 0)),
        ],
        out_specs=pl.BlockSpec((None, c_in, tp), lambda b, j: (b, 0, j)),
        out_shape=jax.ShapeDtypeStruct((n, c_in, p), jnp.float32),
        compiler_params=pltpu.CompilerParams(
            dimension_semantics=("parallel", "parallel"),
            vmem_limit_bytes=vmem_cap),
    )(prm['wfl'], prm['wga'], prm['base'], flow_patches, gate_patches,
      high_b, low_b)

    return fused.reshape(n, c_in, h_lo, w_lo)


# ----------------------------------------------------------------------------
if __name__ == "__main__":
    key = jax.random.PRNGKey(0)
    k_low, k_high, k_w = jax.random.split(key, 3)

    N, INPLANE, OUTPLANE = 2, 16, 8
    H_LO, W_LO, H_HI, W_HI = 16, 16, 8, 8

    low_feature = jax.random.normal(k_low, (N, INPLANE, H_LO, W_LO), jnp.float32)
    h_feature = jax.random.normal(k_high, (N, INPLANE, H_HI, W_HI), jnp.float32)

    prm = build_module(k_w, INPLANE, OUTPLANE, H_LO, W_LO, H_HI, W_HI)

    fwd = jax.jit(lambda lo, hi: aligned_module_v2_forward(lo, hi, prm))
    out = jax.block_until_ready(fwd(low_feature, h_feature))

    assert out.shape == (N, INPLANE, H_LO, W_LO), out.shape
    assert bool(jnp.all(jnp.isfinite(out)))
    print("KERNEL_OK")
</pallas_src>

<mosaic_0001>
module attributes {stable_mosaic.version = 11 : i64} {
  func.func @_frontend_kernel(%arg0: i32, %arg1: memref<8x16xbf16, #tpu.memory_space<vmem>>, %arg2: memref<8x16xbf16, #tpu.memory_space<vmem>>, %arg3: memref<64x256xbf16, #tpu.memory_space<vmem>>, %arg4: memref<1x16x256xbf16, #tpu.memory_space<vmem>>, %arg5: memref<1x16x64xbf16, #tpu.memory_space<vmem>>, %arg6: memref<1x8x256xbf16, #tpu.memory_space<vmem>>, %arg7: memref<1x8x256xbf16, #tpu.memory_space<vmem>>) attributes {dimension_semantics = [#tpu.dimension_semantics<parallel>], iteration_bounds = array<i64: 2>, scalar_prefetch = 0 : i64, scratch_operands = 0 : i64, tpu.core_type = #tpu.core_type<tc>, window_params = [{pipeline_mode = #tpu.pipeline_mode<synchronous>, transform_indices = @transform_0, window_bounds = array<i64: 8, 16>}, {pipeline_mode = #tpu.pipeline_mode<synchronous>, transform_indices = @transform_1, window_bounds = array<i64: 8, 16>}, {pipeline_mode = #tpu.pipeline_mode<synchronous>, transform_indices = @transform_2, window_bounds = array<i64: 64, 256>}, {transform_indices = @transform_3, window_bounds = array<i64: 1, 16, 256>}, {transform_indices = @transform_4, window_bounds = array<i64: 1, 16, 64>}, {transform_indices = @transform_5, window_bounds = array<i64: 1, 8, 256>}, {transform_indices = @transform_6, window_bounds = array<i64: 1, 8, 256>}]} {
    %c0 = arith.constant 0 : index
    %c0_0 = arith.constant 0 : index
    %0 = vector.load %arg1[%c0, %c0_0] : memref<8x16xbf16, #tpu.memory_space<vmem>>, vector<8x16xbf16>
    %c0_1 = arith.constant 0 : index
    %c0_2 = arith.constant 0 : index
    %c0_3 = arith.constant 0 : index
    %1 = vector.load %arg4[%c0_1, %c0_2, %c0_3] : memref<1x16x256xbf16, #tpu.memory_space<vmem>>, vector<1x16x256xbf16>
    %2 = vector.shape_cast %1 : vector<1x16x256xbf16> to vector<16x256xbf16>
    %cst = arith.constant dense<0.000000e+00> : vector<8x256xf32>
    %3 = tpu.matmul %0, %2, %cst {dimension_numbers = #tpu.dot_dimension_numbers<[1], [0], [0], [1], [0, 0, 1, 1], [], []>} : vector<8x16xbf16>, vector<16x256xbf16>, vector<8x256xf32> -> vector<8x256xf32>
    %4 = arith.truncf %3 : vector<8x256xf32> to vector<8x256xbf16>
    %c0_4 = arith.constant 0 : index
    %c0_5 = arith.constant 0 : index
    %c0_6 = arith.constant 0 : index
    %5 = vector.load %arg6[%c0_4, %c0_5, %c0_6] : memref<1x8x256xbf16, #tpu.memory_space<vmem>>, vector<1x8x256xbf16>
    %6 = vector.shape_cast %5 : vector<1x8x256xbf16> to vector<8x256xbf16>
    %7 = vector.shape_cast %4 : vector<8x256xbf16> to vector<1x8x256xbf16>
    tpu.vector_store %arg6[%c0_4, %c0_5, %c0_6], %7 {strides = array<i32>} : memref<1x8x256xbf16, #tpu.memory_space<vmem>>, vector<1x8x256xbf16>,
    %c0_7 = arith.constant 0 : index
    %c0_8 = arith.constant 0 : index
    %8 = vector.load %arg2[%c0_7, %c0_8] : memref<8x16xbf16, #tpu.memory_space<vmem>>, vector<8x16xbf16>
    %c0_9 = arith.constant 0 : index
    %c0_10 = arith.constant 0 : index
    %c0_11 = arith.constant 0 : index
    %9 = vector.load %arg5[%c0_9, %c0_10, %c0_11] : memref<1x16x64xbf16, #tpu.memory_space<vmem>>, vector<1x16x64xbf16>
    %10 = vector.shape_cast %9 : vector<1x16x64xbf16> to vector<16x64xbf16>
    %cst_12 = arith.constant dense<0.000000e+00> : vector<8x64xf32>
    %11 = tpu.matmul %8, %10, %cst_12 {dimension_numbers = #tpu.dot_dimension_numbers<[1], [0], [0], [1], [0, 0, 1, 1], [], []>} : vector<8x16xbf16>, vector<16x64xbf16>, vector<8x64xf32> -> vector<8x64xf32>
    %12 = arith.truncf %11 : vector<8x64xf32> to vector<8x64xbf16>
    %c0_13 = arith.constant 0 : index
    %c0_14 = arith.constant 0 : index
    %13 = vector.load %arg3[%c0_13, %c0_14] : memref<64x256xbf16, #tpu.memory_space<vmem>>, vector<64x256xbf16>
    %cst_15 = arith.constant dense<0.000000e+00> : vector<8x256xf32>
    %14 = tpu.matmul %12, %13, %cst_15 {dimension_numbers = #tpu.dot_dimension_numbers<[1], [0], [0], [1], [0, 0, 1, 1], [], []>} : vector<8x64xbf16>, vector<64x256xbf16>, vector<8x256xf32> -> vector<8x256xf32>
    %15 = arith.truncf %14 : vector<8x256xf32> to vector<8x256xbf16>
    %c0_16 = arith.constant 0 : index
    %c0_17 = arith.constant 0 : index
    %c0_18 = arith.constant 0 : index
    %16 = vector.load %arg7[%c0_16, %c0_17, %c0_18] : memref<1x8x256xbf16, #tpu.memory_space<vmem>>, vector<1x8x256xbf16>
    %17 = vector.shape_cast %16 : vector<1x8x256xbf16> to vector<8x256xbf16>
    %18 = vector.shape_cast %15 : vector<8x256xbf16> to vector<1x8x256xbf16>
    tpu.vector_store %arg7[%c0_16, %c0_17, %c0_18], %18 {strides = array<i32>} : memref<1x8x256xbf16, #tpu.memory_space<vmem>>, vector<1x8x256xbf16>,
    return
  }
  func.func @transform_0(%arg0: i32) -> (i32, i32) {
    %c0_i32 = arith.constant 0 : i32
    %c0_i32_0 = arith.constant 0 : i32
    %c0_i32_1 = arith.constant 0 : i32
    return %c0_i32, %c0_i32_0 : i32, i32
  }
  func.func @transform_1(%arg0: i32) -> (i32, i32) {
    %c0_i32 = arith.constant 0 : i32
    %c0_i32_0 = arith.constant 0 : i32
    %c0_i32_1 = arith.constant 0 : i32
    return %c0_i32, %c0_i32_0 : i32, i32
  }
  func.func @transform_2(%arg0: i32) -> (i32, i32) {
    %c0_i32 = arith.constant 0 : i32
    %c0_i32_0 = arith.constant 0 : i32
    %c0_i32_1 = arith.constant 0 : i32
    return %c0_i32, %c0_i32_0 : i32, i32
  }
  func.func @transform_3(%arg0: i32) -> (i32, i32, i32) {
    %c0_i32 = arith.constant 0 : i32
    %c0_i32_0 = arith.constant 0 : i32
    %c0_i32_1 = arith.constant 0 : i32
    return %arg0, %c0_i32, %c0_i32_0 : i32, i32, i32
  }
  func.func @transform_4(%arg0: i32) -> (i32, i32, i32) {
    %c0_i32 = arith.constant 0 : i32
    %c0_i32_0 = arith.constant 0 : i32
    %c0_i32_1 = arith.constant 0 : i32
    return %arg0, %c0_i32, %c0_i32_0 : i32, i32, i32
  }
  func.func @transform_5(%arg0: i32) -> (i32, i32, i32) {
    %c0_i32 = arith.constant 0 : i32
    %c0_i32_0 = arith.constant 0 : i32
    %c0_i32_1 = arith.constant 0 : i32
    return %arg0, %c0_i32, %c0_i32_0 : i32, i32, i32
  }
  func.func @transform_6(%arg0: i32) -> (i32, i32, i32) {
    %c0_i32 = arith.constant 0 : i32
    %c0_i32_0 = arith.constant 0 : i32
    %c0_i32_1 = arith.constant 0 : i32
    return %arg0, %c0_i32, %c0_i32_0 : i32, i32, i32
  }
}

module attributes {stable_mosaic.version = 11 : i64} {
  func.func @_fused_flow_kernel(%arg0: i32, %arg1: i32, %arg2: memref<8x144xbf16, #tpu.memory_space<vmem>>, %arg3: memref<8x48xbf16, #tpu.memory_space<vmem>>, %arg4: memref<4x128xf32, #tpu.memory_space<vmem>>, %arg5: memref<1x144x128xbf16, #tpu.memory_space<vmem>>, %arg6: memref<1x48x128xbf16, #tpu.memory_space<vmem>>, %arg7: memref<1x16x64xbf16, #tpu.memory_space<vmem>>, %arg8: memref<1x16x256xbf16, #tpu.memory_space<vmem>>, %arg9: memref<1x16x128xf32, #tpu.memory_space<vmem>>) attributes {dimension_semantics = [#tpu.dimension_semantics<parallel>, #tpu.dimension_semantics<parallel>], iteration_bounds = array<i64: 2, 2>, scalar_prefetch = 0 : i64, scratch_operands = 0 : i64, tpu.core_type = #tpu.core_type<tc>, window_params = [{pipeline_mode = #tpu.pipeline_mode<synchronous>, transform_indices = @transform_0, window_bounds = array<i64: 8, 144>}, {pipeline_mode = #tpu.pipeline_mode<synchronous>, transform_indices = @transform_1, window_bounds = array<i64: 8, 48>}, {transform_indices = @transform_2, window_bounds = array<i64: 4, 128>}, {transform_indices = @transform_3, window_bounds = array<i64: 1, 144, 128>}, {transform_indices = @transform_4, window_bounds = array<i64: 1, 48, 128>}, {transform_indices = @transform_5, window_bounds = array<i64: 1, 16, 64>}, {transform_indices = @transform_6, window_bounds = array<i64: 1, 16, 256>}, {transform_indices = @transform_7, window_bounds = array<i64: 1, 16, 128>}]} {
    %c0 = arith.constant 0 : index
    %c0_0 = arith.constant 0 : index
    %0 = vector.load %arg2[%c0, %c0_0] : memref<8x144xbf16, #tpu.memory_space<vmem>>, vector<8x144xbf16>
    %c0_1 = arith.constant 0 : index
    %c0_2 = arith.constant 0 : index
    %c0_3 = arith.constant 0 : index
    %1 = vector.load %arg5[%c0_1, %c0_2, %c0_3] : memref<1x144x128xbf16, #tpu.memory_space<vmem>>, vector<1x144x128xbf16>
    %2 = vector.shape_cast %1 : vector<1x144x128xbf16> to vector<144x128xbf16>
    %cst = arith.constant dense<0.000000e+00> : vector<8x128xf32>
    %3 = tpu.matmul %0, %2, %cst {dimension_numbers = #tpu.dot_dimension_numbers<[1], [0], [0], [1], [0, 0, 1, 1], [], []>} : vector<8x144xbf16>, vector<144x128xbf16>, vector<8x128xf32> -> vector<8x128xf32>
    %c0_4 = arith.constant 0 : index
    %c0_5 = arith.constant 0 : index
    %4 = vector.load %arg3[%c0_4, %c0_5] : memref<8x48xbf16, #tpu.memory_space<vmem>>, vector<8x48xbf16>
    %c0_6 = arith.constant 0 : index
    %c0_7 = arith.constant 0 : index
    %c0_8 = arith.constant 0 : index
    %5 = vector.load %arg6[%c0_6, %c0_7, %c0_8] : memref<1x48x128xbf16, #tpu.memory_space<vmem>>, vector<1x48x128xbf16>
    %6 = vector.shape_cast %5 : vector<1x48x128xbf16> to vector<48x128xbf16>
    %cst_9 = arith.constant dense<0.000000e+00> : vector<8x128xf32>
    %7 = tpu.matmul %4, %6, %cst_9 {dimension_numbers = #tpu.dot_dimension_numbers<[1], [0], [0], [1], [0, 0, 1, 1], [], []>} : vector<8x48xbf16>, vector<48x128xbf16>, vector<8x128xf32> -> vector<8x128xf32>
    %8 = vector.extract_strided_slice %7 {offsets = [0, 0], sizes = [1, 128], strides = [1, 1]} : vector<8x128xf32> to vector<1x128xf32>
    %9 = arith.negf %8 : vector<1x128xf32>
    %10 = math.exp %9 : vector<1x128xf32>
    %cst_10 = arith.constant 1.000000e+00 : f32
    %11 = vector.broadcast %cst_10 : f32 to vector<1x128xf32>
    %12 = arith.addf %11, %10 : vector<1x128xf32>
    %13 = arith.divf %11, %12 : vector<1x128xf32>
    %c0_11 = arith.constant 0 : index
    %c0_12 = arith.constant 0 : index
    %14 = vector.load %arg4[%c0_11, %c0_12] : memref<4x128xf32, #tpu.memory_space<vmem>>, vector<4x128xf32>
    %15 = vector.extract_strided_slice %14 {offsets = [0, 0], sizes = [1, 128], strides = [1, 1]} : vector<4x128xf32> to vector<1x128xf32>
    %16 = vector.extract_strided_slice %3 {offsets = [0, 0], sizes = [1, 128], strides = [1, 1]} : vector<8x128xf32> to vector<1x128xf32>
    %cst_13 = arith.constant 2.187500e-01 : f32
    %17 = vector.broadcast %cst_13 : f32 to vector<1x128xf32>
    %18 = arith.mulf %16, %17 : vector<1x128xf32>
    %19 = arith.addf %15, %18 : vector<1x128xf32>
    %20 = vector.extract_strided_slice %14 {offsets = [1, 0], sizes = [1, 128], strides = [1, 1]} : vector<4x128xf32> to vector<1x128xf32>
    %21 = vector.extract_strided_slice %3 {offsets = [1, 0], sizes = [1, 128], strides = [1, 1]} : vector<8x128xf32> to vector<1x128xf32>
    %cst_14 = arith.constant 2.187500e-01 : f32
    %22 = vector.broadcast %cst_14 : f32 to vector<1x128xf32>
    %23 = arith.mulf %21, %22 : vector<1x128xf32>
    %24 = arith.addf %20, %23 : vector<1x128xf32>
    %25 = math.floor %19 : vector<1x128xf32>
    %26 = math.floor %24 : vector<1x128xf32>
    %27 = arith.subf %19, %25 : vector<1x128xf32>
    %28 = arith.subf %24, %26 : vector<1x128xf32>
    %cst_15 = arith.constant 1.000000e+00 : f32
    %29 = vector.broadcast %cst_15 : f32 to vector<1x128xf32>
    %30 = arith.subf %29, %27 : vector<1x128xf32>
    %cst_16 = arith.constant 0.000000e+00 : f32
    %31 = vector.broadcast %cst_16 : f32 to vector<1x128xf32>
    %32 = arith.cmpf oge, %25, %31 : vector<1x128xf32>
    %cst_17 = arith.constant 7.000000e+00 : f32
    %33 = vector.broadcast %cst_17 : f32 to vector<1x128xf32>
    %34 = arith.cmpf ole, %25, %33 : vector<1x128xf32>
    %35 = arith.andi %32, %34 : vector<1x128xi1>
    %cst_18 = arith.constant 0.000000e+00 : f32
    %cst_19 = arith.constant 7.000000e+00 : f32
    %36 = vector.broadcast %cst_18 : f32 to vector<1x128xf32>
    %37 = arith.maximumf %36, %25 : vector<1x128xf32>
    %38 = vector.broadcast %cst_19 : f32 to vector<1x128xf32>
    %39 = arith.minimumf %38, %37 : vector<1x128xf32>
    %40 = arith.fptosi %39 : vector<1x128xf32> to vector<1x128xi32>
    %41 = tpu.iota {dimensions = array<i32: 0>} : vector<8x128xi32>
    %42 = vector.broadcast %40 : vector<1x128xi32> to vector<8x128xi32>
    %43 = arith.cmpi eq, %41, %42 : vector<8x128xi32>
    %44 = arith.extui %43 : vector<8x128xi1> to vector<8x128xi32>
    %45 = arith.sitofp %44 : vector<8x128xi32> to vector<8x128xf32>
    %46 = arith.extui %35 : vector<1x128xi1> to vector<1x128xi32>
    %47 = arith.sitofp %46 : vector<1x128xi32> to vector<1x128xf32>
    %48 = arith.mulf %30, %47 : vector<1x128xf32>
    %49 = vector.broadcast %48 : vector<1x128xf32> to vector<8x128xf32>
    %50 = arith.mulf %45, %49 : vector<8x128xf32>
    %cst_20 = arith.constant 1.000000e+00 : f32
    %51 = vector.broadcast %cst_20 : f32 to vector<1x128xf32>
    %52 = arith.addf %25, %51 : vector<1x128xf32>
    %cst_21 = arith.constant 0.000000e+00 : f32
    %53 = vector.broadcast %cst_21 : f32 to vector<1x128xf32>
    %54 = arith.cmpf oge, %52, %53 : vector<1x128xf32>
    %cst_22 = arith.constant 7.000000e+00 : f32
    %55 = vector.broadcast %cst_22 : f32 to vector<1x128xf32>
    %56 = arith.cmpf ole, %52, %55 : vector<1x128xf32>
    %57 = arith.andi %54, %56 : vector<1x128xi1>
    %cst_23 = arith.constant 0.000000e+00 : f32
    %cst_24 = arith.constant 7.000000e+00 : f32
    %58 = vector.broadcast %cst_23 : f32 to vector<1x128xf32>
    %59 = arith.maximumf %58, %52 : vector<1x128xf32>
    %60 = vector.broadcast %cst_24 : f32 to vector<1x128xf32>
    %61 = arith.minimumf %60, %59 : vector<1x128xf32>
    %62 = arith.fptosi %61 : vector<1x128xf32> to vector<1x128xi32>
    %63 = tpu.iota {dimensions = array<i32: 0>} : vector<8x128xi32>
    %64 = vector.broadcast %62 : vector<1x128xi32> to vector<8x128xi32>
    %65 = arith.cmpi eq, %63, %64 : vector<8x128xi32>
    %66 = arith.extui %65 : vector<8x128xi1> to vector<8x128xi32>
    %67 = arith.sitofp %66 : vector<8x128xi32> to vector<8x128xf32>
    %68 = arith.extui %57 : vector<1x128xi1> to vector<1x128xi32>
    %69 = arith.sitofp %68 : vector<1x128xi32> to vector<1x128xf32>
    %70 = arith.mulf %27, %69 : vector<1x128xf32>
    %71 = vector.broadcast %70 : vector<1x128xf32> to vector<8x128xf32>
    %72 = arith.mulf %67, %71 : vector<8x128xf32>
    %73 = arith.addf %50, %72 : vector<8x128xf32>
    %cst_25 = arith.constant 1.000000e+00 : f32
    %74 = vector.broadcast %cst_25 : f32 to vector<1x128xf32>
    %75 = arith.subf %74, %28 : vector<1x128xf32>
    %cst_26 = arith.constant 0.000000e+00 : f32
    %76 = vector.broadcast %cst_26 : f32 to vector<1x128xf32>
    %77 = arith.cmpf oge, %26, %76 : vector<1x128xf32>
    %cst_27 = arith.constant 7.000000e+00 : f32
    %78 = vector.broadcast %cst_27 : f32 to vector<1x128xf32>
    %79 = arith.cmpf ole, %26, %78 : vector<1x128xf32>
    %80 = arith.andi %77, %79 : vector<1x128xi1>
    %cst_28 = arith.constant 0.000000e+00 : f32
    %cst_29 = arith.constant 7.000000e+00 : f32
    %81 = vector.broadcast %cst_28 : f32 to vector<1x128xf32>
    %82 = arith.maximumf %81, %26 : vector<1x128xf32>
    %83 = vector.broadcast %cst_29 : f32 to vector<1x128xf32>
    %84 = arith.minimumf %83, %82 : vector<1x128xf32>
    %85 = arith.fptosi %84 : vector<1x128xf32> to vector<1x128xi32>
    %86 = tpu.iota {dimensions = array<i32: 0>} : vector<8x128xi32>
    %87 = vector.broadcast %85 : vector<1x128xi32> to vector<8x128xi32>
    %88 = arith.cmpi eq, %86, %87 : vector<8x128xi32>
    %89 = arith.extui %88 : vector<8x128xi1> to vector<8x128xi32>
    %90 = arith.sitofp %89 : vector<8x128xi32> to vector<8x128xf32>
    %91 = arith.extui %80 : vector<1x128xi1> to vector<1x128xi32>
    %92 = arith.sitofp %91 : vector<1x128xi32> to vector<1x128xf32>
    %93 = arith.mulf %75, %92 : vector<1x128xf32>
    %94 = vector.broadcast %93 : vector<1x128xf32> to vector<8x128xf32>
    %95 = arith.mulf %90, %94 : vector<8x128xf32>
    %cst_30 = arith.constant 1.000000e+00 : f32
    %96 = vector.broadcast %cst_30 : f32 to vector<1x128xf32>
    %97 = arith.addf %26, %96 : vector<1x128xf32>
    %cst_31 = arith.constant 0.000000e+00 : f32
    %98 = vector.broadcast %cst_31 : f32 to vector<1x128xf32>
    %99 = arith.cmpf oge, %97, %98 : vector<1x128xf32>
    %cst_32 = arith.constant 7.000000e+00 : f32
    %100 = vector.broadcast %cst_32 : f32 to vector<1x128xf32>
    %101 = arith.cmpf ole, %97, %100 : vector<1x128xf32>
    %102 = arith.andi %99, %101 : vector<1x128xi1>
    %cst_33 = arith.constant 0.000000e+00 : f32
    %cst_34 = arith.constant 7.000000e+00 : f32
    %103 = vector.broadcast %cst_33 : f32 to vector<1x128xf32>
    %104 = arith.maximumf %103, %97 : vector<1x128xf32>
    %105 = vector.broadcast %cst_34 : f32 to vector<1x128xf32>
    %106 = arith.minimumf %105, %104 : vector<1x128xf32>
    %107 = arith.fptosi %106 : vector<1x128xf32> to vector<1x128xi32>
    %108 = tpu.iota {dimensions = array<i32: 0>} : vector<8x128xi32>
    %109 = vector.broadcast %107 : vector<1x128xi32> to vector<8x128xi32>
    %110 = arith.cmpi eq, %108, %109 : vector<8x128xi32>
    %111 = arith.extui %110 : vector<8x128xi1> to vector<8x128xi32>
    %112 = arith.sitofp %111 : vector<8x128xi32> to vector<8x128xf32>
    %113 = arith.extui %102 : vector<1x128xi1> to vector<1x128xi32>
    %114 = arith.sitofp %113 : vector<1x128xi32> to vector<1x128xf32>
    %115 = arith.mulf %28, %114 : vector<1x128xf32>
    %116 = vector.broadcast %115 : vector<1x128xf32> to vector<8x128xf32>
    %117 = arith.mulf %112, %116 : vector<8x128xf32>
    %118 = arith.addf %95, %117 : vector<8x128xf32>
    %119 = vector.shape_cast %118 : vector<8x128xf32> to vector<8x1x128xf32>
    %120 = vector.shape_cast %73 : vector<8x128xf32> to vector<1x8x128xf32>
    %121 = vector.broadcast %119 : vector<8x1x128xf32> to vector<8x8x128xf32>
    %122 = vector.broadcast %120 : vector<1x8x128xf32> to vector<8x8x128xf32>
    %123 = arith.mulf %121, %122 : vector<8x8x128xf32>
    %124 = vector.shape_cast %123 : vector<8x8x128xf32> to vector<64x128xf32>
    %125 = arith.truncf %124 : vector<64x128xf32> to vector<64x128xbf16>
    %c0_35 = arith.constant 0 : index
    %c0_36 = arith.constant 0 : index
    %c0_37 = arith.constant 0 : index
    %126 = vector.load %arg7[%c0_35, %c0_36, %c0_37] : memref<1x16x64xbf16, #tpu.memory_space<vmem>>, vector<1x16x64xbf16>
    %127 = vector.shape_cast %126 : vector<1x16x64xbf16> to vector<16x64xbf16>
    %cst_38 = arith.constant dense<0.000000e+00> : vector<16x128xf32>
    %128 = tpu.matmul %127, %125, %cst_38 {dimension_numbers = #tpu.dot_dimension_numbers<[1], [0], [0], [1], [0, 0, 1, 1], [], []>} : vector<16x64xbf16>, vector<64x128xbf16>, vector<16x128xf32> -> vector<16x128xf32>
    %129 = vector.extract_strided_slice %14 {offsets = [2, 0], sizes = [1, 128], strides = [1, 1]} : vector<4x128xf32> to vector<1x128xf32>
    %130 = vector.extract_strided_slice %3 {offsets = [2, 0], sizes = [1, 128], strides = [1, 1]} : vector<8x128xf32> to vector<1x128xf32>
    %cst_39 = arith.constant 4.687500e-01 : f32
    %131 = vector.broadcast %cst_39 : f32 to vector<1x128xf32>
    %132 = arith.mulf %130, %131 : vector<1x128xf32>
    %133 = arith.addf %129, %132 : vector<1x128xf32>
    %134 = vector.extract_strided_slice %14 {offsets = [3, 0], sizes = [1, 128], strides = [1, 1]} : vector<4x128xf32> to vector<1x128xf32>
    %135 = vector.extract_strided_slice %3 {offsets = [3, 0], sizes = [1, 128], strides = [1, 1]} : vector<8x128xf32> to vector<1x128xf32>
    %cst_40 = arith.constant 4.687500e-01 : f32
    %136 = vector.broadcast %cst_40 : f32 to vector<1x128xf32>
    %137 = arith.mulf %135, %136 : vector<1x128xf32>
    %138 = arith.addf %134, %137 : vector<1x128xf32>
    %139 = math.floor %133 : vector<1x128xf32>
    %140 = math.floor %138 : vector<1x128xf32>
    %141 = arith.subf %133, %139 : vector<1x128xf32>
    %142 = arith.subf %138, %140 : vector<1x128xf32>
    %cst_41 = arith.constant 1.000000e+00 : f32
    %143 = vector.broadcast %cst_41 : f32 to vector<1x128xf32>
    %144 = arith.subf %143, %141 : vector<1x128xf32>
    %cst_42 = arith.constant 0.000000e+00 : f32
    %145 = vector.broadcast %cst_42 : f32 to vector<1x128xf32>
    %146 = arith.cmpf oge, %139, %145 : vector<1x128xf32>
    %cst_43 = arith.constant 1.500000e+01 : f32
    %147 = vector.broadcast %cst_43 : f32 to vector<1x128xf32>
    %148 = arith.cmpf ole, %139, %147 : vector<1x128xf32>
    %149 = arith.andi %146, %148 : vector<1x128xi1>
    %cst_44 = arith.constant 0.000000e+00 : f32
    %cst_45 = arith.constant 1.500000e+01 : f32
    %150 = vector.broadcast %cst_44 : f32 to vector<1x128xf32>
    %151 = arith.maximumf %150, %139 : vector<1x128xf32>
    %152 = vector.broadcast %cst_45 : f32 to vector<1x128xf32>
    %153 = arith.minimumf %152, %151 : vector<1x128xf32>
    %154 = arith.fptosi %153 : vector<1x128xf32> to vector<1x128xi32>
    %155 = tpu.iota {dimensions = array<i32: 0>} : vector<16x128xi32>
    %156 = vector.broadcast %154 : vector<1x128xi32> to vector<16x128xi32>
    %157 = arith.cmpi eq, %155, %156 : vector<16x128xi32>
    %158 = arith.extui %157 : vector<16x128xi1> to vector<16x128xi32>
    %159 = arith.sitofp %158 : vector<16x128xi32> to vector<16x128xf32>
    %160 = arith.extui %149 : vector<1x128xi1> to vector<1x128xi32>
    %161 = arith.sitofp %160 : vector<1x128xi32> to vector<1x128xf32>
    %162 = arith.mulf %144, %161 : vector<1x128xf32>
    %163 = vector.broadcast %162 : vector<1x128xf32> to vector<16x128xf32>
    %164 = arith.mulf %159, %163 : vector<16x128xf32>
    %cst_46 = arith.constant 1.000000e+00 : f32
    %165 = vector.broadcast %cst_46 : f32 to vector<1x128xf32>
    %166 = arith.addf %139, %165 : vector<1x128xf32>
    %cst_47 = arith.constant 0.000000e+00 : f32
    %167 = vector.broadcast %cst_47 : f32 to vector<1x128xf32>
    %168 = arith.cmpf oge, %166, %167 : vector<1x128xf32>
    %cst_48 = arith.constant 1.500000e+01 : f32
    %169 = vector.broadcast %cst_48 : f32 to vector<1x128xf32>
    %170 = arith.cmpf ole, %166, %169 : vector<1x128xf32>
    %171 = arith.andi %168, %170 : vector<1x128xi1>
    %cst_49 = arith.constant 0.000000e+00 : f32
    %cst_50 = arith.constant 1.500000e+01 : f32
    %172 = vector.broadcast %cst_49 : f32 to vector<1x128xf32>
    %173 = arith.maximumf %172, %166 : vector<1x128xf32>
    %174 = vector.broadcast %cst_50 : f32 to vector<1x128xf32>
    %175 = arith.minimumf %174, %173 : vector<1x128xf32>
    %176 = arith.fptosi %175 : vector<1x128xf32> to vector<1x128xi32>
    %177 = tpu.iota {dimensions = array<i32: 0>} : vector<16x128xi32>
    %178 = vector.broadcast %176 : vector<1x128xi32> to vector<16x128xi32>
    %179 = arith.cmpi eq, %177, %178 : vector<16x128xi32>
    %180 = arith.extui %179 : vector<16x128xi1> to vector<16x128xi32>
    %181 = arith.sitofp %180 : vector<16x128xi32> to vector<16x128xf32>
    %182 = arith.extui %171 : vector<1x128xi1> to vector<1x128xi32>
    %183 = arith.sitofp %182 : vector<1x128xi32> to vector<1x128xf32>
    %184 = arith.mulf %141, %183 : vector<1x128xf32>
    %185 = vector.broadcast %184 : vector<1x128xf32> to vector<16x128xf32>
    %186 = arith.mulf %181, %185 : vector<16x128xf32>
    %187 = arith.addf %164, %186 : vector<16x128xf32>
    %cst_51 = arith.constant 1.000000e+00 : f32
    %188 = vector.broadcast %cst_51 : f32 to vector<1x128xf32>
    %189 = arith.subf %188, %142 : vector<1x128xf32>
    %cst_52 = arith.constant 0.000000e+00 : f32
    %190 = vector.broadcast %cst_52 : f32 to vector<1x128xf32>
    %191 = arith.cmpf oge, %140, %190 : vector<1x128xf32>
    %cst_53 = arith.constant 1.500000e+01 : f32
    %192 = vector.broadcast %cst_53 : f32 to vector<1x128xf32>
    %193 = arith.cmpf ole, %140, %192 : vector<1x128xf32>
    %194 = arith.andi %191, %193 : vector<1x128xi1>
    %cst_54 = arith.constant 0.000000e+00 : f32
    %cst_55 = arith.constant 1.500000e+01 : f32
    %195 = vector.broadcast %cst_54 : f32 to vector<1x128xf32>
    %196 = arith.maximumf %195, %140 : vector<1x128xf32>
    %197 = vector.broadcast %cst_55 : f32 to vector<1x128xf32>
    %198 = arith.minimumf %197, %196 : vector<1x128xf32>
    %199 = arith.fptosi %198 : vector<1x128xf32> to vector<1x128xi32>
    %200 = tpu.iota {dimensions = array<i32: 0>} : vector<16x128xi32>
    %201 = vector.broadcast %199 : vector<1x128xi32> to vector<16x128xi32>
    %202 = arith.cmpi eq, %200, %201 : vector<16x128xi32>
    %203 = arith.extui %202 : vector<16x128xi1> to vector<16x128xi32>
    %204 = arith.sitofp %203 : vector<16x128xi32> to vector<16x128xf32>
    %205 = arith.extui %194 : vector<1x128xi1> to vector<1x128xi32>
    %206 = arith.sitofp %205 : vector<1x128xi32> to vector<1x128xf32>
    %207 = arith.mulf %189, %206 : vector<1x128xf32>
    %208 = vector.broadcast %207 : vector<1x128xf32> to vector<16x128xf32>
    %209 = arith.mulf %204, %208 : vector<16x128xf32>
    %cst_56 = arith.constant 1.000000e+00 : f32
    %210 = vector.broadcast %cst_56 : f32 to vector<1x128xf32>
    %211 = arith.addf %140, %210 : vector<1x128xf32>
    %cst_57 = arith.constant 0.000000e+00 : f32
    %212 = vector.broadcast %cst_57 : f32 to vector<1x128xf32>
    %213 = arith.cmpf oge, %211, %212 : vector<1x128xf32>
    %cst_58 = arith.constant 1.500000e+01 : f32
    %214 = vector.broadcast %cst_58 : f32 to vector<1x128xf32>
    %215 = arith.cmpf ole, %211, %214 : vector<1x128xf32>
    %216 = arith.andi %213, %215 : vector<1x128xi1>
    %cst_59 = arith.constant 0.000000e+00 : f32
    %cst_60 = arith.constant 1.500000e+01 : f32
    %217 = vector.broadcast %cst_59 : f32 to vector<1x128xf32>
    %218 = arith.maximumf %217, %211 : vector<1x128xf32>
    %219 = vector.broadcast %cst_60 : f32 to vector<1x128xf32>
    %220 = arith.minimumf %219, %218 : vector<1x128xf32>
    %221 = arith.fptosi %220 : vector<1x128xf32> to vector<1x128xi32>
    %222 = tpu.iota {dimensions = array<i32: 0>} : vector<16x128xi32>
    %223 = vector.broadcast %221 : vector<1x128xi32> to vector<16x128xi32>
    %224 = arith.cmpi eq, %222, %223 : vector<16x128xi32>
    %225 = arith.extui %224 : vector<16x128xi1> to vector<16x128xi32>
    %226 = arith.sitofp %225 : vector<16x128xi32> to vector<16x128xf32>
    %227 = arith.extui %216 : vector<1x128xi1> to vector<1x128xi32>
    %228 = arith.sitofp %227 : vector<1x128xi32> to vector<1x128xf32>
    %229 = arith.mulf %142, %228 : vector<1x128xf32>
    %230 = vector.broadcast %229 : vector<1x128xf32> to vector<16x128xf32>
    %231 = arith.mulf %226, %230 : vector<16x128xf32>
    %232 = arith.addf %209, %231 : vector<16x128xf32>
    %233 = vector.shape_cast %232 : vector<16x128xf32> to vector<16x1x128xf32>
    %234 = vector.shape_cast %187 : vector<16x128xf32> to vector<1x16x128xf32>
    %235 = vector.broadcast %233 : vector<16x1x128xf32> to vector<16x16x128xf32>
    %236 = vector.broadcast %234 : vector<1x16x128xf32> to vector<16x16x128xf32>
    %237 = arith.mulf %235, %236 : vector<16x16x128xf32>
    %238 = vector.shape_cast %237 : vector<16x16x128xf32> to vector<256x128xf32>
    %239 = arith.truncf %238 : vector<256x128xf32> to vector<256x128xbf16>
    %c0_61 = arith.constant 0 : index
    %c0_62 = arith.constant 0 : index
    %c0_63 = arith.constant 0 : index
    %240 = vector.load %arg8[%c0_61, %c0_62, %c0_63] : memref<1x16x256xbf16, #tpu.memory_space<vmem>>, vector<1x16x256xbf16>
    %241 = vector.shape_cast %240 : vector<1x16x256xbf16> to vector<16x256xbf16>
    %cst_64 = arith.constant dense<0.000000e+00> : vector<16x128xf32>
    %242 = tpu.matmul %241, %239, %cst_64 {dimension_numbers = #tpu.dot_dimension_numbers<[1], [0], [0], [1], [0, 0, 1, 1], [], []>} : vector<16x256xbf16>, vector<256x128xbf16>, vector<16x128xf32> -> vector<16x128xf32>
    %243 = arith.subf %128, %242 : vector<16x128xf32>
    %244 = vector.broadcast %13 : vector<1x128xf32> to vector<16x128xf32>
    %245 = arith.mulf %244, %243 : vector<16x128xf32>
    %246 = arith.addf %242, %245 : vector<16x128xf32>
    %c0_65 = arith.constant 0 : index
    %c0_66 = arith.constant 0 : index
    %c0_67 = arith.constant 0 : index
    %247 = vector.load %arg9[%c0_65, %c0_66, %c0_67] : memref<1x16x128xf32, #tpu.memory_space<vmem>>, vector<1x16x128xf32>
    %248 = vector.shape_cast %247 : vector<1x16x128xf32> to vector<16x128xf32>
    %249 = vector.shape_cast %246 : vector<16x128xf32> to vector<1x16x128xf32>
    tpu.vector_store %arg9[%c0_65, %c0_66, %c0_67], %249 {strides = array<i32>} : memref<1x16x128xf32, #tpu.memory_space<vmem>>, vector<1x16x128xf32>,
    return
  }
  func.func @transform_0(%arg0: i32, %arg1: i32) -> (i32, i32) {
    %c0_i32 = arith.constant 0 : i32
    %c0_i32_0 = arith.constant 0 : i32
    %c0_i32_1 = arith.constant 0 : i32
    return %c0_i32, %c0_i32_0 : i32, i32
  }
  func.func @transform_1(%arg0: i32, %arg1: i32) -> (i32, i32) {
    %c0_i32 = arith.constant 0 : i32
    %c0_i32_0 = arith.constant 0 : i32
    %c0_i32_1 = arith.constant 0 : i32
    return %c0_i32, %c0_i32_0 : i32, i32
  }
  func.func @transform_2(%arg0: i32, %arg1: i32) -> (i32, i32) {
    %c0_i32 = arith.constant 0 : i32
    %c0_i32_0 = arith.constant 0 : i32
    return %c0_i32, %arg1 : i32, i32
  }
  func.func @transform_3(%arg0: i32, %arg1: i32) -> (i32, i32, i32) {
    %c0_i32 = arith.constant 0 : i32
    %c0_i32_0 = arith.constant 0 : i32
    return %arg0, %c0_i32, %arg1 : i32, i32, i32
  }
  func.func @transform_4(%arg0: i32, %arg1: i32) -> (i32, i32, i32) {
    %c0_i32 = arith.constant 0 : i32
    %c0_i32_0 = arith.constant 0 : i32
    return %arg0, %c0_i32, %arg1 : i32, i32, i32
  }
  func.func @transform_5(%arg0: i32, %arg1: i32) -> (i32, i32, i32) {
    %c0_i32 = arith.constant 0 : i32
    %c0_i32_0 = arith.constant 0 : i32
    %c0_i32_1 = arith.constant 0 : i32
    return %arg0, %c0_i32, %c0_i32_0 : i32, i32, i32
  }
  func.func @transform_6(%arg0: i32, %arg1: i32) -> (i32, i32, i32) {
    %c0_i32 = arith.constant 0 : i32
    %c0_i32_0 = arith.constant 0 : i32
    %c0_i32_1 = arith.constant 0 : i32
    return %arg0, %c0_i32, %c0_i32_0 : i32, i32, i32
  }
  func.func @transform_7(%arg0: i32, %arg1: i32) -> (i32, i32, i32) {
    %c0_i32 = arith.constant 0 : i32
    %c0_i32_0 = arith.constant 0 : i32
    return %arg0, %c0_i32, %arg1 : i32, i32, i32
  }
}

</mosaic_0001>

<bundles_post_ra>
// kernel: _lambda_.2
= control target key start
LH: loop header
LB: loop body
LE: loop exit
PB: predicated region body
PF: predicated region fallthrough
CT: control target
= control target key end

     0   :  { %s1567_s0 = inlined_call_operand.hbm [shape: bf16[8,16], index: 0, kind: input, shape index: {}]   ;;  %s1568_s1 = inlined_call_operand.hbm [shape: bf16[8,16], index: 1, kind: input, shape index: {}]   ;;  %s1569_s2 = inlined_call_operand.hbm [shape: bf16[64,256], index: 2, kind: input, shape index: {}]   ;;  %s1570_s3 = inlined_call_operand.hbm [shape: bf16[2,16,256], index: 3, kind: input, shape index: {}]   ;;  %s1571_s4 = inlined_call_operand.hbm [shape: bf16[2,16,64], index: 4, kind: input, shape index: {}]   ;;  %s1572_s5 = inlined_call_operand.hbm [shape: bf16[2,8,256], index: 5, kind: output, shape index: {0}]   ;;  %s1573_s6 = inlined_call_operand.hbm [shape: bf16[2,8,256], index: 6, kind: output, shape index: {1}]  }
   0x1   :  { %1589 = sst [smem:[#allocation24_spill]] %s1568_s1 }
   0x2   :  { %1590 = sst [smem:[#allocation25_spill]] %s1570_s3 }
   0x3   :  { %12 = vsyncpa [#allocation3], 0 }
   0x4   :  { %13 = vsyncpa [#allocation6], 0 }
   0x5   :  { %14 = vsyncpa [#allocation9], 0 }
   0x6   :  { %16 = vsyncpa [#allocation9 + $0x1], 0 }
   0x7   :  { %17 = vsyncpa [#allocation4], 0 }
   0x8   :  { %19 = vsyncpa [#allocation4 + $0x1], 0 }
   0x9   :  { %20 = vsyncpa [#allocation13], 0 }
   0xa   :  { %22 = vsyncpa [#allocation13 + $0x1], 0  ;;  %s1237_s21 = smov 0   ;;  %s1239_s22 = smov 0  }
   0xb   :  { %s1241_s23 = smov 0   ;;  %s1243_s24 = smov 0  }
   0xc LB: > { %1591 = sst [smem:[#allocation19_spill]] %s1174_s21  ;;  %s1258_s25 = sadd.s32 4294967295, %s1186_s24   ;;  %s1186_s24 = sphi %s1243_s24, %s1626_s24   ;;  %s1182_s23 = sphi %s1241_s23, %s1628_s23   ;;  %s1178_s22 = sphi %s1239_s22, %s1630_s22   ;;  %s1174_s21 = sphi %s1237_s21, %s1629_s21  }
   0xd   : > { %1592 = sst [smem:[#allocation20_spill]] %s1182_s23  ;;  %s768_s26 = sadd.s32 4294967294, %s1186_s24  }
   0xe   : > { %p111_p0 = scmp.ne.s32.totalorder %s1178_s22, %s1174_s21  ;;  %p1574_p1 = scmp.eq.s32.totalorder %s1258_s25, 0 }
   0xf   : > { %p167_p3 = scmp.eq.s32.totalorder %s768_s26, 1  ;;  %p769_p5 = scmp.ge.s32.totalorder %s1186_s24, 1 }
  0x10   : > { %p1267_p4 = por %p1574_p1, %p111_p0  ;;  %p200_p7 = scmp.lt.s32.totalorder %s1186_s24, 3 }
  0x11   : > { %p1272_p6 = por %p167_p3, %p111_p0  ;;  %s1188_s30 = smov [#allocation5]  }
  0x12   : > { %s1593_s27 = scalar_select %p1267_p4, 1, 0 }
  0x13   : > { %s1594_s28 = scalar_select %p1272_p6, 1, 0 }
  0x14   : > { %p1277_p8 = pnand %p769_p5, %p200_p7  ;;  %s224_s7 = sshll.u32 %s1188_s30, 4  ;;  %s225_s7 = int_to_ptr.vmem [resolvable:$true] %s224_s7 }
  0x15   : > { %1595 = sst [smem:[#allocation21_spill]] %s1594_s28  ;;  %s1285_s8 = sadd.s32 1, %s1186_s24  }
  0x16   : > { %s1596_s29 = scalar_select %p1277_p8, 1, 0 }
  0x17   : > { %p846_p10 = pneg %p1277_p8  ;;  %1597 = sst [smem:[#allocation22_spill]] %s1285_s8 }
  0x18   : > { %s95_s10 = ssub.s32 %s1186_s24, %s1285_s8  ;;  %s98_s12 = sadd.s32 1, %s1182_s23 }
  0x19   : > { %p1289_p11 = pnand %p846_p10, %p1574_p1  ;;  %p1295_p12 = scmp.eq.s32.totalorder %s95_s10, 0 }
  0x1a   : > { %s1600_s1 = sld [smem:[#allocation24_spill]] }
  0x1b   : > { %s1598_s9 = scalar_select %p1289_p11, 1, 0 }
  0x1c   : > { %s1599_s11 = scalar_select %p1295_p12, 1, 0 }
  0x1d   : > { %p1310_p3 = pneg %p1289_p11 }
  0x20   : > { %s936_s15 = scalar_lea.hbm %s1600_s1, 64 }
  0x21   : > { %p937_p0 = scmp.ne.s32.totalorder %s1600_s1, %s936_s15  ;;  %p943_p10 = scmp.lt.u32.totalorder %s936_s15, %s1600_s1 }
  0x23   : > { %p939_p5 = pnand %p1310_p3, %p937_p0 }
  0x25   : > { %p940_p7 = pneg %p939_p5 }
  0x27   : > { %p945_p9 = pnand %p943_p10, %p940_p7 }
  0x29   : > { %948 = shalt.err (!%p945_p9)
}
  0x2a   : > { %s949_s26 = scalar_lea.vmem %s225_s7, 64  ;;  %p957_p6 = scmp.lt.s32.totalorder %s225_s7, %s225_s7 }
  0x2b   : > { %p950_p1 = scmp.ne.s32.totalorder %s225_s7, %s949_s26  ;;  %p958_p4 = scmp.lt.s32.totalorder %s949_s26, %s949_s26 }
  0x2d   : > { %p952_p2 = pnand %p950_p1, %p1310_p3  ;;  %p959_p8 = por %p958_p4, %p957_p6 }
  0x2f   : > { %p953_p13 = pneg %p952_p2 }
  0x31   : > { %p960_p12 = pnand %p959_p8, %p953_p13 }
  0x33   : > { %963 = shalt.err (!%p960_p12)
}
  0x34   : > { %852 = dma.hbm_to_vmem [thread:$0]  (!%p1289_p11), %s1600_s1, 64, %s225_s7, [#allocation6]  }
  0x35   : > { %p1602_p1 = scmp.ne.s32.totalorder %s1599_s11, 0  ;;  %p106_p2 = scmp.eq.s32.totalorder %s1186_s24, 0 }
  0x36   : > { %p1604_p4 = scmp.ne.s32.totalorder %s1182_s23, %s1178_s22  ;;  %p1605_p6 = scmp.eq.s32.totalorder %s1258_s25, 1 }
  0x37   : > { %s1329_s13 = scalar_select %p1602_p1, %s1182_s23, %s98_s12  }
  0x38   : > { %p1337_p8 = por %p1605_p6, %p1604_p4  ;;  %p1607_p9 = pmov %p1604_p4 }
  0x39   : > { %1603 = sst [smem:[#allocation23_spill]] %s1329_s13  ;;  %p873_p13 = scmp.lt.s32.totalorder %s1186_s24, 2 }
  0x3a   : > { %s1606_s14 = scalar_select %p1337_p8, 1, 0 }
  0x3b   : > { %p107_p12 = por %p106_p2, %p1607_p9  ;;  %s248_s15 = sand.u32 1, %s1186_s24  }
  0x3c   : > { %s250_s16 = sand.u32 1, %s1182_s23   ;;  %s812_s19 = sshll.u32 %s1186_s24, 8 }
  0x3d   : > { %s774_s17 = sshll.u32 %s250_s16, 4  ;;  %s1608_s3 = sld [smem:[#allocation25_spill]] }
  0x3e   : > { %s252_s11 = scalar_lea.vmem [#allocation8], %s774_s17  ;;  %p1355_p0 = pnand %p873_p13, %p107_p12 }
  0x3f   : > { %s259_s12 = sshll.u32 %s252_s11, 4  ;;  %s1359_s10 = sshll.u32 %s250_s16, 3  ;;  %s1353_s12 = int_to_ptr.vmem [resolvable:$true] %s259_s12 }
  0x40   : > { %s1609_s30 = scalar_select %p1355_p0, 1, 0 }
  0x41   : > { %s1361_s1 = scalar_lea.sflag [#allocation9], %s248_s15  ;;  %p1585_p7 = pneg %p1355_p0 }
  0x43   : > { %s1351_s7 = scalar_lea.hbm %s1608_s3, %s812_s19  ;;  %s969_s26 = scalar_lea.hbm %s1608_s3, 512 }
  0x44   : > { %s964_s19 = scalar_lea.hbm %s1351_s7, 256  ;;  %p970_p2 = scmp.lt.u32.totalorder %s1351_s7, %s1608_s3 }
  0x45   : > { %p965_p5 = scmp.ne.s32.totalorder %s1351_s7, %s964_s19  ;;  %p971_p4 = scmp.lt.u32.totalorder %s969_s26, %s964_s19 }
  0x46   : > { %p973_p9 = scmp.lt.u32.totalorder %s964_s19, %s1351_s7 }
  0x47   : > { %p967_p10 = pnand %p1585_p7, %p965_p5  ;;  %p972_p6 = por %p971_p4, %p970_p2 }
  0x49   : > { %p968_p1 = pneg %p967_p10  ;;  %p974_p12 = por %p973_p9, %p972_p6 }
  0x4b   : > { %p975_p13 = pnand %p974_p12, %p968_p1 }
  0x4d   : > { %978 = shalt.err (!%p975_p13)
}
  0x4e   : > { %s979_s15 = scalar_lea.vmem %s1353_s12, 256  ;;  %s1189_s16 = smov [#allocation8]  }
  0x4f   : > { %p980_p5 = scmp.ne.s32.totalorder %s1353_s12, %s979_s15  ;;  %s984_s17 = sshll.u32 %s1189_s16, 4  ;;  %s985_s17 = int_to_ptr.vmem [resolvable:$false] %s984_s17 }
  0x50   : > { %s986_s13 = scalar_lea.vmem %s985_s17, 512  ;;  %p987_p11 = scmp.lt.s32.totalorder %s1353_s12, %s985_s17 }
  0x51   : > { %p982_p10 = pnand %p980_p5, %p1585_p7  ;;  %p988_p2 = scmp.lt.s32.totalorder %s986_s13, %s979_s15 }
  0x53   : > { %p983_p8 = pneg %p982_p10  ;;  %p989_p4 = por %p988_p2, %p987_p11 }
  0x55   : > { %p990_p6 = pnand %p989_p4, %p983_p8 }
  0x57   : > { %993 = shalt.err (!%p990_p6)
}
  0x58   : > { %s1586_s19 = smov 128   ;;  %s1191_s20 = smov 8  }
  0x59   : > { %859 = dma.hbm_to_vmem [thread:$0]  (!%p1355_p0), %s1351_s7, 256, %s1353_s12, %s1361_s1, %s1586_s19, %s1586_s19, %s1191_s20  }
  0x5a   : > { %s273_s26 = scalar_lea.vmem [#allocation10], %s1359_s10  ;;  %s1192_s15 = smov [#allocation2]  }
  0x5b   : > { %s1393_s11 = sshll.u32 %s273_s26, 4  ;;  %s213_s16 = sshll.u32 %s1192_s15, 4  ;;  %s214_s16 = int_to_ptr.vmem [resolvable:$true] %s213_s16  ;;  %s1441_s11 = int_to_ptr.vmem [resolvable:$true] %s1393_s11 }
  0x5c   : > { %s994_s3 = scalar_lea.hbm %s1567_s0, 64 }
  0x5d   : > { %p995_p11 = scmp.ne.s32.totalorder %s1567_s0, %s994_s3  ;;  %p1001_p9 = scmp.lt.u32.totalorder %s994_s3, %s1567_s0 }
  0x5f   : > { %p997_p8 = pnand %p995_p11, %p1310_p3 }
  0x61   : > { %p998_p1 = pneg %p997_p8 }
  0x63   : > { %p1003_p12 = pnand %p1001_p9, %p998_p1 }
  0x65   : > { %1006 = shalt.err (!%p1003_p12)
}
  0x66   : > { %s1007_s7 = scalar_lea.vmem %s214_s16, 64  ;;  %p1015_p2 = scmp.lt.s32.totalorder %s214_s16, %s214_s16 }
  0x67   : > { %p1008_p13 = scmp.ne.s32.totalorder %s214_s16, %s1007_s7  ;;  %p1016_p4 = scmp.lt.s32.totalorder %s1007_s7, %s1007_s7 }
  0x69   : > { %p1010_p5 = pnand %p1008_p13, %p1310_p3  ;;  %p1017_p6 = por %p1016_p4, %p1015_p2 }
  0x6b   : > { %p1011_p10 = pneg %p1010_p5 }
  0x6d   : > { %p1018_p7 = pnand %p1017_p6, %p1011_p10 }
  0x6f   : > { %1021 = shalt.err (!%p1018_p7)
}
  0x70   : > { %p1610_p11 = scmp.ne.s32.totalorder %s1598_s9, 0  ;;  %s1193_s3 = smov [#allocation7]  }
  0x71   : > { %s234_s21 = sshll.u32 %s1193_s3, 4  ;;  %s813_s28 = sshll.u32 %s1186_s24, 7  ;;  %s235_s21 = int_to_ptr.vmem [resolvable:$true] %s234_s21 }
  0x72   : > { %849 = dma.hbm_to_vmem [thread:$0]  (!%p1610_p11), %s1567_s0, 64, %s214_s16, [#allocation3]  }
  0x73   : > { %s1417_s26 = scalar_lea.hbm %s1571_s4, %s813_s28  ;;  %s1022_s13 = scalar_lea.hbm %s1569_s2, 1024 }
  0x74   : > { %p1023_p7 = scmp.ne.s32.totalorder %s1569_s2, %s1022_s13  ;;  %p1029_p9 = scmp.lt.u32.totalorder %s1022_s13, %s1569_s2 }
  0x76   : > { %p1025_p8 = pnand %p1023_p7, %p1310_p3 }
  0x78   : > { %p1026_p1 = pneg %p1025_p8 }
  0x7a   : > { %p1031_p12 = pnand %p1029_p9, %p1026_p1 }
  0x7c   : > { %1034 = shalt.err (!%p1031_p12)
}
  0x7d   : > { %s1035_s8 = scalar_lea.vmem %s235_s21, 1024  ;;  %p1043_p2 = scmp.lt.s32.totalorder %s235_s21, %s235_s21 }
  0x7e   : > { %p1036_p13 = scmp.ne.s32.totalorder %s235_s21, %s1035_s8  ;;  %p1044_p4 = scmp.lt.s32.totalorder %s1035_s8, %s1035_s8 }
  0x80   : > { %p1038_p5 = pnand %p1036_p13, %p1310_p3  ;;  %p1045_p6 = por %p1044_p4, %p1043_p2 }
  0x82   : > { %p1039_p10 = pneg %p1038_p5 }
  0x84   : > { %p1046_p0 = pnand %p1045_p6, %p1039_p10 }
  0x86   : > { %1049 = shalt.err (!%p1046_p0)
}
  0x87   : > { %s1611_s19 = smov 128   ;;  %s1050_s18 = scalar_lea.hbm %s1417_s26, 128 }
  0x88   : > { %855 = dma.hbm_to_vmem [thread:$0]  (!%p1610_p11), %s1569_s2, 1024, %s235_s21, [#allocation6], %s1611_s19, %s1611_s19, %s1191_s20  }
  0x89   : > { %p1051_p3 = scmp.ne.s32.totalorder %s1417_s26, %s1050_s18  ;;  %p1612_p0 = scmp.ne.s32.totalorder %s1609_s30, 0 }
  0x8a   : > { %s1055_s10 = scalar_lea.hbm %s1571_s4, 256  ;;  %p1056_p9 = scmp.lt.u32.totalorder %s1417_s26, %s1571_s4 }
  0x8b   : > { %p1613_p7 = pneg %p1612_p0  ;;  %p1057_p12 = scmp.lt.u32.totalorder %s1055_s10, %s1050_s18 }
  0x8c   : > { %p1059_p5 = scmp.lt.u32.totalorder %s1050_s18, %s1417_s26 }
  0x8d   : > { %p1053_p8 = pnand %p1051_p3, %p1613_p7  ;;  %p1058_p13 = por %p1057_p12, %p1056_p9 }
  0x8f   : > { %p1054_p1 = pneg %p1053_p8  ;;  %p1060_p11 = por %p1059_p5, %p1058_p13 }
  0x91   : > { %p1061_p10 = pnand %p1060_p11, %p1054_p1 }
  0x93   : > { %1064 = shalt.err (!%p1061_p10)
}
  0x94   : > { %s1065_s20 = scalar_lea.vmem %s1441_s11, 128  ;;  %p1614_p4 = pmov %p1613_p7 }
  0x95   : > { %p1066_p2 = scmp.ne.s32.totalorder %s1441_s11, %s1065_s20  ;;  %s1194_s21 = smov [#allocation10]  }
  0x96   : > { %s1070_s13 = sshll.u32 %s1194_s21, 4  ;;  %s1071_s13 = int_to_ptr.vmem [resolvable:$false] %s1070_s13 }
  0x97   : > { %p1068_p6 = pnand %p1066_p2, %p1614_p4  ;;  %s1072_s7 = scalar_lea.vmem %s1071_s13, 256 }
  0x98   : > { %p1073_p7 = scmp.lt.s32.totalorder %s1441_s11, %s1071_s13  ;;  %p1074_p8 = scmp.lt.s32.totalorder %s1072_s7, %s1065_s20 }
  0x99   : > { %p1069_p3 = pneg %p1068_p6 }
  0x9a   : > { %p1075_p9 = por %p1074_p8, %p1073_p7 }
  0x9c   : > { %p1076_p12 = pnand %p1075_p9, %p1069_p3 }
  0x9e   : > { %1079 = shalt.err (!%p1076_p12)
}
  0x9f   : > { %s1195_s16 = smov 64   ;;  %s1196_s23 = smov 4  }
  0xa0   : > { %862 = dma.hbm_to_vmem [thread:$0]  (!%p1612_p0), %s1417_s26, 128, %s1441_s11, %s1361_s1, %s1195_s16, %s1195_s16, %s1196_s23  }
  0xa1   : > { %p1615_p1 = scmp.ne.s32.totalorder %s1596_s29, 0 }
  0xa2   : > { %p1616_p13 = scmp.eq.s32.totalorder (!%p1615_p1), %s1258_s25, 0 }
  0xa3   : > { %292 = sbr.rel (%p1615_p1) target bundleno = 637 (0x27d), region = 40 }
  0xaa   : > { %1153 = dma.done.wait (%p1616_p13), [#allocation3], 64   ;;  %p1617_p5 = pmov %p1616_p13 }
  0xac   : > { %1155 = vsyncadd (%p1617_p5), [#allocation3], 4294967232  ;;  %p1618_p11 = pmov %p1617_p5 }
  0xad   : > { %p1619_p10 = pmov %p1617_p5 }
  0xae   : > { %1157 = dma.done.wait (%p1618_p11), [#allocation6], 1088  }
  0xaf   : > { %1159 = vsyncadd (%p1619_p10), [#allocation6], 4294966208  ;;  %s306_s30 = sand.u32 1, %s1258_s25   ;;  %s1479_s1 = sand.u32 1, %s1178_s22  }
  0xb0   : > { %s784_s29 = sshll.u32 %s1479_s1, 4  ;;  %s307_s11 = scalar_lea.sflag [#allocation9], %s306_s30 }
  0xb1   : > { %s310_s26 = scalar_lea.vmem [#allocation8], %s784_s29  ;;  %p1620_p0 = scmp.ne.s32.totalorder %s1593_s27, 0 }
  0xb3   : > { %1161 = dma.done.wait (%p1620_p0), %s307_s11, 384  }
  0xb4   : > { %1163 = vsyncadd (%p1620_p0), %s307_s11, 4294966912  ;;  %v1197_v0 = vmov 0   ;;  %s1487_s8 = sshll.u32 %s1479_s1, 3  ;;  %v920_v1 = vld [vmem:[%s310_s26 + $0x4] ss:$8 sps:$4 sm:$0xff]   ;;  %vm372_vm0 = vcmask 130048  }
  0xb5   : > { %408 = vmatprep.mubr.bf16.mxu1 %v1197_v0  ;;  %563 = vmatprep.mubr.bf16.mxu0 %v1197_v0  ;;  %v922_v2 = vld [vmem:[%s310_s26] ss:$8 sps:$4 sm:$0xff]   ;;  %s319_s19 = scalar_lea.vmem [#allocation10], %s1487_s8  ;;  %v924_v5 = vld [vmem:[#allocation7 + $0x4] ss:$8 sps:$4 sm:$0xff]   ;;  %v1198_v6 = vmov 0.0  }
  0xb6   : > { %376 = vmatprep.subr.bf16.mxu1 %v920_v1  ;;  %v359_v3 = vld [vmem:[#allocation2] sm:$0xf]  ;;  %v923_v4 = vld [vmem:[%s319_s19] sm:$0xff]   ;;  %531 = vmatprep.subr.bf16.mxu0 %v924_v5  ;;  %v927_v8 = vld [vmem:[#allocation7 + $0x14] ss:$8 sps:$4 sm:$0xff]   ;;  %vm1199_vm1 = vmmov 0  }
  0xb7   : > { %377 = vmatpush1.bf16.msra.mxu1 %v922_v2  ;;  %v926_v7 = vld [vmem:[#allocation7] ss:$8 sps:$4 sm:$0xff]   ;;  %v426_v9 = vld [vmem:[#allocation5] sm:$0xf]  ;;  %v929_v10 = vld [vmem:[#allocation7 + $0x10] ss:$8 sps:$4 sm:$0xff]  }
  0xb8   : > { %820 = vmatprep.subr.bf16.mxu1 %v1198_v6  ;;  %532 = vmatpush1.bf16.msra.mxu0 %v926_v7  ;;  %v930_v11 = vld [vmem:[#allocation7 + $0x24] ss:$8 sps:$4 sm:$0xff]   ;;  %v932_v12 = vld [vmem:[#allocation7 + $0x20] ss:$8 sps:$4 sm:$0xff]   ;;  %v933_v13 = vld [vmem:[#allocation7 + $0x34] ss:$8 sps:$4 sm:$0xff]  }
  0xb9   : > { %533 = vmatprep.subr.bf16.mxu0 %v927_v8  ;;  %v935_v14 = vld [vmem:[#allocation7 + $0x30] ss:$8 sps:$4 sm:$0xff]   ;;  %s350_s27 = scalar_lea.vmem [#allocation11], %s1487_s8  ;;  %vm527_vm2 = vcmask 523264   ;;  %s816_s3 = sshll.u32 %s1258_s25, 7 }
  0xba   : > { %790 = vmatmul.mubr.msk.bf16.vlgmr.msra.gmra.mrb[0].mxu1 %vm372_vm0, %v359_v3  ;;  %s601_s28 = sshll.u32 %s350_s27, 4  ;;  %s1497_s12 = scalar_lea.hbm %s1572_s5, %s816_s3  ;;  %s602_s28 = int_to_ptr.vmem [resolvable:$true] %s601_s28 }
  0xbb   : > { %821 = vmatpush3.bf16.msra.mxu1 %v923_v4  ;;  %822 = vmatprep.mubr.msk.bf16.mxu1 %vm1199_vm1, %v1198_v6  ;;  %s582_s10 = scalar_lea.sflag [#allocation4], %s1479_s1  ;;  %s1080_s15 = scalar_lea.vmem %s602_s28, 128 }
  0xbc   : > { %534 = vmatpush1.bf16.msra.mxu0 %v929_v10  ;;  %p1081_p2 = scmp.ne.s32.totalorder %s602_s28, %s1080_s15  ;;  %p1621_p4 = scmp.ne.s32.totalorder %s1606_s14, 0 }
  0xbd   : > { %535 = vmatprep.subr.bf16.mxu0 %v930_v11  ;;  %s1200_s17 = smov [#allocation11]  }
  0xbe   : > { %p1082_p6 = pnand %p1081_p2, %p1621_p4  ;;  %s1084_s20 = sshll.u32 %s1200_s17, 4  ;;  %s1085_s20 = int_to_ptr.vmem [resolvable:$false] %s1084_s20 }
  0xbf   : > { %s1086_s21 = scalar_lea.vmem %s1085_s20, 256  ;;  %p1087_p7 = scmp.lt.s32.totalorder %s602_s28, %s1085_s20 }
  0xc0   : > { %536 = vmatpush1.bf16.msra.mxu0 %v932_v12  ;;  %p1083_p3 = pneg %p1082_p6  ;;  %p1088_p8 = scmp.lt.s32.totalorder %s1086_s21, %s1080_s15 }
  0xc1   : > { %537 = vmatprep.subr.bf16.mxu0 %v933_v13 }
  0xc2   : > { %823 = vmatmul.mubr.msk.bf16.vlgmr.msra.gmra.mrb[4].mxu1 %vm372_vm0, %v426_v9  ;;  %p1089_p9 = por %p1088_p8, %p1087_p7 }
  0xc4   : > { %538 = vmatpush1.bf16.msra.mxu0 %v935_v14  ;;  %p1090_p12 = pnand %p1089_p9, %p1083_p3 }
 0x18d   : > { %v410_v15 = vpop.f32.mrb[0].mxu1 }
 0x18e   : > { %v412_v16 = vpop.f32.mrb[1].mxu1 }
 0x18f   : > { %v814_v17 = vpack.c.bf16 %v412_v16, %v410_v15  ;;  %v414_v18 = vpop.f32.mrb[2].mxu1 }
 0x190   : > { %v415_v19 = vpop.f32.mrb[3].mxu1 }
 0x191   : > { %425 = vst [vmem:[%s350_s27] sm:$0xff] %v814_v17 }
 0x195   : > { %v472_v20 = vpop.f32.mrb[4].mxu1 }
 0x196   : > { %v478_v21 = vpack.c.bf16 %v472_v20, %v472_v20  ;;  %v824_v22 = vpop.f32.mrb[5].mxu1 }
 0x197   : > { %v475_v23 = vpop.f32.mrb[6].mxu1 }
 0x198   : > { %v825_v24 = vpop.f32.mrb[7].mxu1  ;;  %802 = vmatmul.mubr.msk.bf16.vlgmr.msra.gmra.mrb[0].mxu0 %vm527_vm2, %v478_v21 }
 0x199   : > { %1093 = shalt.err (!%p1090_p12)
}
 0x19a   : > { %s1094_s13 = scalar_lea.hbm %s1497_s12, 128  ;;  %s1098_s23 = scalar_lea.hbm %s1572_s5, 256 }
 0x19b   : > { %p1095_p1 = scmp.ne.s32.totalorder %s1497_s12, %s1094_s13  ;;  %p1099_p11 = scmp.lt.u32.totalorder %s1497_s12, %s1572_s5 }
 0x19c   : > { %p1100_p10 = scmp.lt.u32.totalorder %s1098_s23, %s1094_s13  ;;  %p1102_p2 = scmp.lt.u32.totalorder %s1094_s13, %s1497_s12 }
 0x19d   : > { %p1096_p13 = pnand %p1095_p1, %p1621_p4 }
 0x19e   : > { %p1101_p0 = por %p1100_p10, %p1099_p11 }
 0x19f   : > { %p1097_p5 = pneg %p1096_p13 }
 0x1a0   : > { %p1103_p6 = por %p1102_p2, %p1101_p0 }
 0x1a2   : > { %p1104_p3 = pnand %p1103_p6, %p1097_p5 }
 0x1a4   : > { %1107 = shalt.err (!%p1104_p3)
}
 0x1a5   : > { %842 = dma.vmem_to_hbm [thread:$0]  (%p1621_p4), %s602_s28, 128, %s1497_s12, %s582_s10  }
 0x1a6   : > { %s357_s11 = scalar_lea.vmem [#allocation12], %s1487_s8  ;;  %s1523_s18 = scalar_lea.hbm %s1573_s6, %s816_s3 }
 0x1a7   : > { %s615_s26 = sshll.u32 %s357_s11, 4  ;;  %s587_s28 = scalar_lea.sflag [#allocation13], %s1479_s1  ;;  %s1525_s26 = int_to_ptr.vmem [resolvable:$true] %s615_s26 }
 0x1a8   : > { %s1108_s8 = scalar_lea.vmem %s1525_s26, 128  ;;  %s1201_s9 = smov [#allocation12]  }
 0x1a9   : > { %p1109_p7 = scmp.ne.s32.totalorder %s1525_s26, %s1108_s8  ;;  %s1112_s25 = sshll.u32 %s1201_s9, 4  ;;  %s1113_s25 = int_to_ptr.vmem [resolvable:$false] %s1112_s25 }
 0x1aa   : > { %s1114_s12 = scalar_lea.vmem %s1113_s25, 256  ;;  %p1115_p12 = scmp.lt.s32.totalorder %s1525_s26, %s1113_s25 }
 0x1ab   : > { %p1110_p8 = pnand %p1109_p7, %p1621_p4  ;;  %p1116_p1 = scmp.lt.s32.totalorder %s1114_s12, %s1108_s8 }
 0x1ad   : > { %p1111_p9 = pneg %p1110_p8  ;;  %p1117_p13 = por %p1116_p1, %p1115_p12 }
 0x1af   : > { %p1118_p5 = pnand %p1117_p13, %p1111_p9 }
 0x26b   : > { %v565_v25 = vpop.f32.mrb[0].mxu0 }
 0x26c   : > { %v567_v26 = vpop.f32.mrb[1].mxu0 }
 0x26d   : > { %v815_v27 = vpack.c.bf16 %v567_v26, %v565_v25  ;;  %v569_v28 = vpop.f32.mrb[2].mxu0 }
 0x26e   : > { %v570_v29 = vpop.f32.mrb[3].mxu0 }
 0x26f   : > { %580 = vst [vmem:[%s357_s11] sm:$0xff] %v815_v27 }
 0x270   : > { %1121 = shalt.err (!%p1118_p5)
}
 0x271   : > { %s1122_s1 = scalar_lea.hbm %s1523_s18, 128  ;;  %s1126_s15 = scalar_lea.hbm %s1573_s6, 256 }
 0x272   : > { %p1123_p11 = scmp.ne.s32.totalorder %s1523_s18, %s1122_s1  ;;  %p1127_p2 = scmp.lt.u32.totalorder %s1523_s18, %s1573_s6 }
 0x273   : > { %p1128_p6 = scmp.lt.u32.totalorder %s1126_s15, %s1122_s1  ;;  %p1130_p7 = scmp.lt.u32.totalorder %s1122_s1, %s1523_s18 }
 0x274   : > { %p1124_p10 = pnand %p1123_p11, %p1621_p4 }
 0x275   : > { %p1129_p3 = por %p1128_p6, %p1127_p2 }
 0x276   : > { %p1125_p0 = pneg %p1124_p10 }
 0x277   : > { %p1131_p8 = por %p1130_p7, %p1129_p3 }
 0x279   : > { %p1132_p9 = pnand %p1131_p8, %p1125_p0 }
 0x27b   : > { %1135 = shalt.err (!%p1132_p9)
}
 0x27c   : > { %843 = dma.vmem_to_hbm [thread:$0]  (%p1621_p4), %s1525_s26, 128, %s1523_s18, %s587_s28  }
 0x27d PF: > { %s1622_s21 = sld [smem:[#allocation19_spill]]  ;;  %s1623_s13 = sld [smem:[#allocation21_spill]] }
 0x27e   : > { %p1625_p1 = scmp.ge.s32.totalorder %s1186_s24, 2 }
 0x283   : > { %s627_s7 = sand.u32 1, %s1622_s21   ;;  %p1624_p12 = scmp.ne.s32.totalorder %s1623_s13, 0 }
 0x284   : > { %s628_s16 = scalar_lea.sflag [#allocation4], %s627_s7 }
 0x285   : > { %p864_p13 = pnand %p1625_p1, %p1624_p12 }
 0x287   : > { %1165 = dma.done.wait (!%p864_p13), %s628_s16, 128  }
 0x288   : > { %1167 = vsyncadd (!%p864_p13), %s628_s16, 4294967168  ;;  %s637_s23 = scalar_lea.sflag [#allocation13], %s627_s7 }
 0x289   : > { %1169 = dma.done.wait (!%p864_p13), %s637_s23, 128  }
 0x28a   : > { %1171 = vsyncadd (!%p864_p13), %s637_s23, 4294967168  ;;  %s1626_s24 = sld [smem:[#allocation22_spill]]  ;;  %s1627_s14 = sld [smem:[#allocation20_spill]] }
 0x28b   : > { %s1628_s23 = sld [smem:[#allocation23_spill]]  ;;  %s1629_s21 = smov %s1178_s22 }
 0x290   : > { %p25_p4 = scmp.ge.s32.totalorder %s1626_s24, 4   ;;  %s1630_s22 = smov %s1627_s14 }
 0x292   :  { %27 = sbr.rel (!%p25_p4) target bundleno = 12 (0xc), region = 126 }
 0x299   :  { %642 = vsyncpa [#allocation3], 1 }
 0x29a   :  { %644 = vsyncpa [#allocation3 + $0x1], 1 }
 0x29b   :  { %645 = vsyncpa [#allocation6], 1 }
 0x29c   :  { %646 = vsyncpa [#allocation9], 1 }
 0x29d   :  { %648 = vsyncpa [#allocation9 + $0x1], 1 }
 0x29e   :  { %649 = vsyncpa [#allocation4], 1 }
 0x29f   :  { %651 = vsyncpa [#allocation4 + $0x1], 1 }
 0x2a0   :  { %652 = vsyncpa [#allocation13], 1 }
 0x2a1   :  { %654 = vsyncpa [#allocation13 + $0x1], 1 }

// kernel: _lambda_.3
= control target key start
LH: loop header
LB: loop body
LE: loop exit
PB: predicated region body
PF: predicated region fallthrough
CT: control target
= control target key end

     0   :  { %s3024_s0 = inlined_call_operand.hbm [shape: bf16[8,144], index: 0, kind: input, shape index: {}]   ;;  %s3025_s1 = inlined_call_operand.hbm [shape: bf16[8,48], index: 1, kind: input, shape index: {}]   ;;  %s3026_s2 = inlined_call_operand.hbm [shape: f32[4,256], index: 2, kind: input, shape index: {}]   ;;  %s3027_s3 = inlined_call_operand.hbm [shape: bf16[2,144,256], index: 3, kind: input, shape index: {}]   ;;  %s3028_s4 = inlined_call_operand.hbm [shape: bf16[2,48,256], index: 4, kind: input, shape index: {}]   ;;  %s3029_s5 = inlined_call_operand.hbm [shape: bf16[2,16,64], index: 5, kind: input, shape index: {}]   ;;  %s3030_s6 = inlined_call_operand.hbm [shape: bf16[2,16,256], index: 6, kind: input, shape index: {}]   ;;  %s3031_s7 = inlined_call_operand.hbm [shape: f32[2,16,256], index: 7, kind: output, shape index: {}]  }
   0x1   :  { %3064 = sst [smem:[#allocation35_spill]] %s3024_s0 }
   0x2   :  { %3065 = sst [smem:[#allocation36_spill]] %s3026_s2 }
   0x3   :  { %3066 = sst [smem:[#allocation37_spill]] %s3027_s3 }
   0x4   :  { %3067 = sst [smem:[#allocation38_spill]] %s3031_s7 }
   0x5   :  { %12 = vsyncpa [#allocation3], 0 }
   0x6   :  { %13 = vsyncpa [#allocation6], 0 }
   0x7   :  { %14 = vsyncpa [#allocation4], 0 }
   0x8   :  { %16 = vsyncpa [#allocation4 + $0x1], 0  ;;  %s2268_s24 = smov 0   ;;  %s2270_s25 = smov 0  }
   0x9   :  { %s2272_s26 = smov 0   ;;  %s2274_s27 = smov 0  }
   0xa   :  { %s2276_s28 = smov 0   ;;  %s2278_s29 = smov 0  }
   0xb   :  { %s2280_s30 = smov 0   ;;  %s2282_s8 = smov 0  }
   0xc   :  { %s2284_s9 = smov 0   ;;  %s2286_s10 = smov 0  }
   0xd   :  { %s2288_s11 = smov 0   ;;  %s2290_s12 = smov 0  }
   0xe   :  { %s2292_s13 = smov 0   ;;  %s2294_s14 = smov 0  }
   0xf LB: > { %3068 = sst [smem:[#allocation19_spill]] %s2167_s27  ;;  %s2337_s15 = sadd.s32 4294967295, %s2207_s14   ;;  %s2207_s14 = sphi %s2294_s14, %s22_s14   ;;  %s2203_s13 = sphi %s2292_s13, %s3147_s13   ;;  %s2199_s12 = sphi %s2290_s12, %s3146_s12   ;;  %s2195_s11 = sphi %s2288_s11, %s3145_s11   ;;  %s2191_s10 = sphi %s2286_s10, %s3144_s10   ;;  %s2187_s9 = sphi %s2284_s9, %s3137_s9   ;;  %s2183_s8 = sphi %s2282_s8, %s3143_s8   ;;  %s2179_s30 = sphi %s2280_s30, %s3135_s30   ;;  %s2175_s29 = sphi %s2278_s29, %s3134_s29   ;;  %s2171_s28 = sphi %s2276_s28, %s3133_s28   ;;  %s2167_s27 = sphi %s2274_s27, %s3132_s27   ;;  %s2163_s26 = sphi %s2272_s26, %s3142_s26   ;;  %s2159_s25 = sphi %s2270_s25, %s3141_s25   ;;  %s2155_s24 = sphi %s2268_s24, %s3140_s24  }
  0x10   : > { %3069 = sst [smem:[#allocation20_spill]] %s2171_s28  ;;  %s1506_s16 = sadd.s32 4294967294, %s2207_s14  }
  0x11   : > { %3070 = sst [smem:[#allocation21_spill]] %s2175_s29  ;;  %p3038_p0 = scmp.eq.s32.totalorder %s2337_s15, 0 }
  0x12   : > { %3071 = sst [smem:[#allocation22_spill]] %s2183_s8  ;;  %p3037_p1 = scmp.ne.s32.totalorder %s2175_s29, %s2171_s28 }
  0x13   : > { %3072 = sst [smem:[#allocation23_spill]] %s2187_s9  ;;  %p124_p2 = scmp.ne.s32.totalorder %s2171_s28, %s2167_s27 }
  0x14   : > { %3073 = sst [smem:[#allocation24_spill]] %s2191_s10  ;;  %p178_p3 = scmp.ne.s32.totalorder %s2159_s25, %s2155_s24 }
  0x15   : > { %3074 = sst [smem:[#allocation25_spill]] %s2195_s11  ;;  %p230_p4 = scmp.eq.s32.totalorder %s2337_s15, 3 }
  0x16   : > { %p236_p5 = scmp.eq.s32.totalorder %s1506_s16, 3  ;;  %p2349_p6 = por %p124_p2, %p3038_p0 }
  0x17   : > { %p2355_p7 = por %p178_p3, %p3038_p0  ;;  %p2362_p8 = por %p230_p4, %p3037_p1 }
  0x18   : > { %s3075_s17 = scalar_select %p2349_p6, 1, 0 }
  0x19   : > { %s3077_s18 = scalar_select %p2355_p7, 1, 0 }
  0x1a   : > { %3076 = sst [smem:[#allocation26_spill]] %s3075_s17  ;;  %p2366_p9 = por %p236_p5, %p124_p2 }
  0x1b   : > { %3078 = sst [smem:[#allocation27_spill]] %s3077_s18  ;;  %p1507_p10 = scmp.ge.s32.totalorder %s2207_s14, 1 }
  0x1c   : > { %s3079_s19 = scalar_select %p2362_p8, 1, 0 }
  0x1d   : > { %s3081_s20 = scalar_select %p2366_p9, 1, 0 }
  0x1e   : > { %3080 = sst [smem:[#allocation28_spill]] %s3079_s19  ;;  %p243_p11 = scmp.lt.s32.totalorder %s2207_s14, 5 }
  0x1f   : > { %3082 = sst [smem:[#allocation29_spill]] %s3081_s20  ;;  %s2209_s22 = smov [#allocation2]  }
  0x20   : > { %p2372_p12 = pnand %p1507_p10, %p243_p11  ;;  %s256_s23 = sshll.u32 %s2209_s22, 4  ;;  %s257_s23 = int_to_ptr.vmem [resolvable:$true] %s256_s23 }
  0x21   : > { %s3085_s0 = sld [smem:[#allocation35_spill]] }
  0x22   : > { %s3083_s21 = scalar_select %p2372_p12, 1, 0 }
  0x23   : > { %p1659_p13 = pneg %p2372_p12 }
  0x25   : > { %p2380_p3 = pnand %p1659_p13, %p3038_p0 }
  0x27   : > { %s3084_s24 = scalar_select %p2380_p3, 1, 0 }
  0x28   : > { %s1839_s20 = scalar_lea.hbm %s3085_s0, 128  ;;  %p3053_p4 = pneg %p2380_p3 }
  0x29   : > { %p1840_p2 = scmp.ne.s32.totalorder %s3085_s0, %s1839_s20  ;;  %p1846_p11 = scmp.lt.u32.totalorder %s1839_s20, %s3085_s0 }
  0x2b   : > { %p1842_p5 = pnand %p3053_p4, %p1840_p2 }
  0x2d   : > { %p1843_p10 = pneg %p1842_p5 }
  0x2f   : > { %p1848_p13 = pnand %p1846_p11, %p1843_p10 }
  0x31   : > { %1851 = shalt.err (!%p1848_p13)
}
  0x32   : > { %s1852_s27 = scalar_lea.vmem %s257_s23, 128  ;;  %p1860_p8 = scmp.lt.s32.totalorder %s257_s23, %s257_s23 }
  0x33   : > { %p1853_p1 = scmp.ne.s32.totalorder %s257_s23, %s1852_s27  ;;  %p1861_p7 = scmp.lt.s32.totalorder %s1852_s27, %s1852_s27 }
  0x35   : > { %p1855_p0 = pnand %p1853_p1, %p3053_p4  ;;  %p1862_p6 = por %p1861_p7, %p1860_p8 }
  0x37   : > { %p1856_p9 = pneg %p1855_p0 }
  0x39   : > { %p1863_p12 = pnand %p1862_p6, %p1856_p9 }
  0x3b   : > { %1866 = shalt.err (!%p1863_p12)
}
  0x3c   : > { %1662 = dma.hbm_to_vmem [thread:$0]  (!%p2380_p3), %s3085_s0, 128, %s257_s23, [#allocation3]  }
  0x3d   : > { %s31_s10 = sadd.s32 1, %s2199_s12  ;;  %s34_s20 = sadd.s32 1, %s2203_s13 }
  0x3e   : > { %p32_p0 = scmp.ge.s32.totalorder %s31_s10, 2  ;;  %s83_s16 = sadd.s32 1, %s2187_s9 }
  0x3f   : > { %p90_p1 = scmp.ne.s32.totalorder %s2187_s9, %s2183_s8  ;;  %p3055_p6 = scmp.eq.s32.totalorder %s2207_s14, 0 }
  0x40   : > { %s3149_s10 = smov (%p32_p0, %s31_s10), 0  ;;  %s3151_s20 = smov (!%p32_p0, %s34_s20), %s2203_s13 }
  0x41   : > { %3086 = sst [smem:[#allocation30_spill]] %s3149_s10  ;;  %s80_s22 = ssub.s32 %s2199_s12, %s3149_s10 }
  0x42   : > { %p36_p7 = scmp.ge.s32.totalorder %s3151_s20, 2  ;;  %p81_p8 = scmp.eq.s32.totalorder %s80_s22, 0 }
  0x43   : > { %p2419_p9 = por %p3055_p6, %p90_p1  ;;  %p96_p12 = scmp.ne.s32.totalorder %s2183_s8, %s2179_s30 }
  0x44   : > { %s3153_s20 = smov (%p36_p7, %s3151_s20), 0  ;;  %p3090_p2 = scmp.eq.s32.totalorder %s2337_s15, 0 }
  0x45   : > { %3088 = sst [smem:[#allocation31_spill]] %s3153_s20  ;;  %s2438_s19 = ssub.s32 %s2203_s13, %s3153_s20 }
  0x46   : > { %s2428_s27 = scalar_select %p81_p8, %s2187_s9, %s83_s16  }
  0x47   : > { %p2432_p5 = por %p3090_p2, %p96_p12  ;;  %s108_s0 = sor.u32 %s2438_s19, %s80_s22 }
  0x48   : > { %3089 = sst [smem:[#allocation32_spill]] %s2428_s27  ;;  %s111_s10 = sadd.s32 1, %s2175_s29 }
  0x49   : > { %s3091_s7 = scalar_select %p2432_p5, 1, 0 }
  0x4a   : > { %p109_p10 = scmp.eq.s32.totalorder %s108_s0, 0  ;;  %p3093_p11 = scmp.ne.s32.totalorder %s2175_s29, %s2171_s28 }
  0x4b   : > { %3092 = sst [smem:[#allocation33_spill]] %s3091_s7  ;;  %p3054_p1 = scmp.lt.s32.totalorder %s2207_s14, 4 }
  0x4c   : > { %p2447_p13 = por %p3093_p11, %p3055_p6  ;;  %s278_s20 = sand.u32 1, %s2207_s14  }
  0x4d   : > { %s2454_s16 = scalar_select %p109_p10, %s2175_s29, %s111_s10  }
  0x4e   : > { %s280_s27 = sand.u32 1, %s2187_s9   ;;  %s1512_s22 = sshll.u32 %s2199_s12, 6 }
  0x4f   : > { %3095 = sst [smem:[#allocation34_spill]] %s2454_s16  ;;  %s1511_s11 = sshll.u32 %s280_s27, 2 }
  0x50   : > { %s3096_s2 = sld [smem:[#allocation36_spill]]  ;;  %s282_s28 = scalar_lea.vmem [#allocation7], %s1511_s11 }
  0x51   : > { %s289_s7 = sshll.u32 %s282_s28, 4  ;;  %p2470_p7 = pnand %p3054_p1, %p2419_p9  ;;  %s2464_s7 = int_to_ptr.vmem [resolvable:$true] %s289_s7 }
  0x52   : > { %p2478_p8 = pnand %p3054_p1, %p2447_p13  ;;  %s298_s18 = sand.u32 1, %s2175_s29  }
  0x53   : > { %s2485_s28 = smul.u32 72, %s298_s18  ;;  %s2487_s11 = scalar_lea.sflag [#allocation3], %s278_s20 }
  0x54   : > { %p1869_p9 = pneg %p2470_p7 }
  0x56   : > { %s2462_s0 = scalar_lea.hbm %s3096_s2, %s1512_s22  ;;  %s1872_s22 = scalar_lea.hbm %s3096_s2, 128 }
  0x57   : > { %s1867_s23 = scalar_lea.hbm %s2462_s0, 64  ;;  %p1873_p11 = scmp.lt.u32.totalorder %s2462_s0, %s3096_s2 }
  0x58   : > { %p1868_p12 = scmp.ne.s32.totalorder %s2462_s0, %s1867_s23  ;;  %p1874_p13 = scmp.lt.u32.totalorder %s1872_s22, %s1867_s23 }
  0x59   : > { %p1876_p1 = scmp.lt.u32.totalorder %s1867_s23, %s2462_s0 }
  0x5a   : > { %p1870_p2 = pnand %p1869_p9, %p1868_p12  ;;  %p1875_p4 = por %p1874_p13, %p1873_p11 }
  0x5c   : > { %p1871_p10 = pneg %p1870_p2  ;;  %p1877_p6 = por %p1876_p1, %p1875_p4 }
  0x5e   : > { %p1878_p0 = pnand %p1877_p6, %p1871_p10 }
  0x60   : > { %1881 = shalt.err (!%p1878_p0)
}
  0x61   : > { %s1882_s20 = scalar_lea.vmem %s2464_s7, 64  ;;  %s2210_s27 = smov [#allocation7]  }
  0x62   : > { %p1883_p12 = scmp.ne.s32.totalorder %s2464_s7, %s1882_s20  ;;  %s1887_s30 = sshll.u32 %s2210_s27, 4  ;;  %s1888_s30 = int_to_ptr.vmem [resolvable:$false] %s1887_s30 }
  0x63   : > { %s1889_s9 = scalar_lea.vmem %s1888_s30, 128  ;;  %p1890_p3 = scmp.lt.s32.totalorder %s2464_s7, %s1888_s30 }
  0x64   : > { %p1885_p2 = pnand %p1883_p12, %p1869_p9  ;;  %p1891_p11 = scmp.lt.s32.totalorder %s1889_s9, %s1882_s20 }
  0x66   : > { %p1886_p5 = pneg %p1885_p2  ;;  %p1892_p13 = por %p1891_p11, %p1890_p3 }
  0x68   : > { %p1893_p4 = pnand %p1892_p13, %p1886_p5 }
  0x6a   : > { %1896 = shalt.err (!%p1893_p4)
}
  0x6b   : > { %1669 = dma.hbm_to_vmem [thread:$0]  (!%p2470_p7), %s2462_s0, 64, %s2464_s7, %s2487_s11  }
  0x6c   : > { %s1626_s16 = smul.u32 36, %s2203_s13  ;;  %s300_s23 = scalar_lea.vmem [#allocation8], %s2485_s28 }
  0x6d   : > { %s308_s22 = sshll.u32 %s300_s23, 4  ;;  %s3099_s3 = sld [smem:[#allocation37_spill]]  ;;  %s2517_s22 = int_to_ptr.vmem [resolvable:$true] %s308_s22 }
  0x6e   : > { %s305_s20 = sadd.s32 %s2199_s12, %s1626_s16  ;;  %s2527_s2 = smul.u32 24, %s298_s18 }
  0x6f   : > { %s1513_s27 = sshll.u32 %s305_s20, 6  ;;  %p1899_p6 = pneg %p2478_p8 }
  0x73   : > { %s2523_s10 = scalar_lea.hbm %s3099_s3, %s1513_s27  ;;  %s1902_s16 = scalar_lea.hbm %s3099_s3, 4608 }
  0x74   : > { %s1897_s7 = scalar_lea.hbm %s2523_s10, 1152  ;;  %p1903_p1 = scmp.lt.u32.totalorder %s2523_s10, %s3099_s3 }
  0x75   : > { %p1898_p3 = scmp.ne.s32.totalorder %s2523_s10, %s1897_s7  ;;  %p1904_p7 = scmp.lt.u32.totalorder %s1902_s16, %s1897_s7 }
  0x76   : > { %p1906_p10 = scmp.lt.u32.totalorder %s1897_s7, %s2523_s10 }
  0x77   : > { %p1900_p5 = pnand %p1899_p6, %p1898_p3  ;;  %p1905_p9 = por %p1904_p7, %p1903_p1 }
  0x79   : > { %p1901_p0 = pneg %p1900_p5  ;;  %p1907_p12 = por %p1906_p10, %p1905_p9 }
  0x7b   : > { %p1908_p2 = pnand %p1907_p12, %p1901_p0 }
  0x7d   : > { %1911 = shalt.err (!%p1908_p2)
}
  0x7e   : > { %s1912_s18 = scalar_lea.vmem %s2517_s22, 1152  ;;  %s2211_s27 = smov [#allocation8]  }
  0x7f   : > { %p1913_p11 = scmp.ne.s32.totalorder %s2517_s22, %s1912_s18  ;;  %s1917_s30 = sshll.u32 %s2211_s27, 4  ;;  %s1918_s30 = int_to_ptr.vmem [resolvable:$false] %s1917_s30 }
  0x80   : > { %s1919_s9 = scalar_lea.vmem %s1918_s30, 2304  ;;  %p1920_p3 = scmp.lt.s32.totalorder %s2517_s22, %s1918_s30 }
  0x81   : > { %p1915_p13 = pnand %p1913_p11, %p1899_p6  ;;  %p1921_p5 = scmp.lt.s32.totalorder %s1919_s9, %s1912_s18 }
  0x83   : > { %p1916_p4 = pneg %p1915_p13  ;;  %p1922_p1 = por %p1921_p5, %p1920_p3 }
  0x85   : > { %p1923_p7 = pnand %p1922_p1, %p1916_p4 }
  0x87   : > { %1926 = shalt.err (!%p1923_p7)
}
  0x88   : > { %s2212_s7 = smov 128   ;;  %s2213_s0 = smov 64  }
  0x89   : > { %s2214_s28 = smov 4   ;;  %s1628_s16 = smul.u32 12, %s2203_s13 }
  0x8a   : > { %1672 = dma.hbm_to_vmem [thread:$0]  (!%p2478_p8), %s2523_s10, 1152, %s2517_s22, %s2487_s11, %s2212_s7, %s2213_s0, %s2214_s28  }
  0x8b   : > { %s322_s23 = scalar_lea.vmem [#allocation9], %s2527_s2  ;;  %s327_s18 = sadd.s32 %s2199_s12, %s1628_s16 }
  0x8c   : > { %s330_s20 = sshll.u32 %s322_s23, 4  ;;  %s1514_s27 = sshll.u32 %s327_s18, 6  ;;  %s2561_s20 = int_to_ptr.vmem [resolvable:$true] %s330_s20 }
  0x8d   : > { %s2566_s3 = scalar_lea.hbm %s3028_s4, %s1514_s27  ;;  %s165_s29 = sadd.s32 1, %s2163_s26 }
  0x8e   : > { %s1927_s8 = scalar_lea.hbm %s2566_s3, 384  ;;  %s1932_s10 = scalar_lea.hbm %s3028_s4, 1536 }
  0x8f   : > { %p1928_p0 = scmp.ne.s32.totalorder %s2566_s3, %s1927_s8  ;;  %p1933_p12 = scmp.lt.u32.totalorder %s2566_s3, %s3028_s4 }
  0x90   : > { %p1934_p2 = scmp.lt.u32.totalorder %s1932_s10, %s1927_s8  ;;  %p1936_p13 = scmp.lt.u32.totalorder %s1927_s8, %s2566_s3 }
  0x91   : > { %p1930_p9 = pnand %p1928_p0, %p1899_p6 }
  0x92   : > { %p1935_p11 = por %p1934_p2, %p1933_p12 }
  0x93   : > { %p1931_p10 = pneg %p1930_p9 }
  0x94   : > { %p1937_p4 = por %p1936_p13, %p1935_p11 }
  0x96   : > { %p1938_p3 = pnand %p1937_p4, %p1931_p10 }
  0x98   : > { %1941 = shalt.err (!%p1938_p3)
}
  0x99   : > { %s1942_s18 = scalar_lea.vmem %s2561_s20, 384  ;;  %s2215_s27 = smov [#allocation9]  }
  0x9a   : > { %p1943_p5 = scmp.ne.s32.totalorder %s2561_s20, %s1942_s18  ;;  %s1947_s30 = sshll.u32 %s2215_s27, 4  ;;  %s1948_s30 = int_to_ptr.vmem [resolvable:$false] %s1947_s30 }
  0x9b   : > { %s1949_s9 = scalar_lea.vmem %s1948_s30, 768  ;;  %p1950_p0 = scmp.lt.s32.totalorder %s2561_s20, %s1948_s30 }
  0x9c   : > { %p1945_p1 = pnand %p1943_p5, %p1899_p6  ;;  %p1951_p9 = scmp.lt.s32.totalorder %s1949_s9, %s1942_s18 }
  0x9e   : > { %p1946_p7 = pneg %p1945_p1  ;;  %p1952_p12 = por %p1951_p9, %p1950_p0 }
  0xa0   : > { %p1953_p2 = pnand %p1952_p12, %p1946_p7 }
  0xa2   : > { %1956 = shalt.err (!%p1953_p2)
}
  0xa3   : > { %1675 = dma.hbm_to_vmem [thread:$0]  (!%p2478_p8), %s2566_s3, 384, %s2561_s20, %s2487_s11, %s2212_s7, %s2213_s0, %s2214_s28  }
  0xa4   : > { %p3100_p6 = scmp.eq.s32.totalorder %s2438_s19, 0  ;;  %p172_p10 = scmp.ne.s32.totalorder %s2163_s26, %s2159_s25 }
  0xa5   : > { %s342_s17 = sand.u32 1, %s2163_s26   ;;  %s1570_s22 = sshll.u32 %s2203_s13, 7 }
  0xa6   : > { %s2601_s8 = scalar_select %p3100_p6, %s2163_s26, %s165_s29  }
  0xa7   : > { %s1515_s2 = sshll.u32 %s342_s17, 3  ;;  %p3101_p11 = scmp.eq.s32.totalorder %s2207_s14, 0 }
  0xa8   : > { %s2612_s23 = scalar_lea.hbm %s3029_s5, %s1570_s22  ;;  %s344_s18 = scalar_lea.vmem [#allocation10], %s1515_s2 }
  0xa9   : > { %p174_p13 = por %p172_p10, %p3101_p11  ;;  %s351_s3 = sshll.u32 %s344_s18, 4  ;;  %s2614_s3 = int_to_ptr.vmem [resolvable:$true] %s351_s3 }
  0xaa   : > { %p3102_p8 = scmp.lt.s32.totalorder %s2207_s14, 4  ;;  %s2622_s19 = sshll.u32 %s342_s17, 4 }
  0xab   : > { %s2216_s20 = smov [#allocation5]   ;;  %s1957_s30 = scalar_lea.hbm %s2612_s23, 128 }
  0xac   : > { %p2618_p4 = pnand %p3102_p8, %p174_p13  ;;  %s2624_s27 = sshll.u32 %s2216_s20, 4  ;;  %s268_s27 = int_to_ptr.vmem [resolvable:$true] %s2624_s27 }
  0xad   : > { %p1958_p3 = scmp.ne.s32.totalorder %s2612_s23, %s1957_s30  ;;  %s1962_s22 = scalar_lea.hbm %s3029_s5, 256 }
  0xae   : > { %s3103_s29 = scalar_select %p2618_p4, 1, 0 }
  0xaf   : > { %p3061_p5 = pneg %p2618_p4  ;;  %p1963_p0 = scmp.lt.u32.totalorder %s2612_s23, %s3029_s5 }
  0xb0   : > { %p1964_p9 = scmp.lt.u32.totalorder %s1962_s22, %s1957_s30  ;;  %p1966_p2 = scmp.lt.u32.totalorder %s1957_s30, %s2612_s23 }
  0xb1   : > { %p1960_p1 = pnand %p3061_p5, %p1958_p3 }
  0xb2   : > { %p1965_p12 = por %p1964_p9, %p1963_p0 }
  0xb3   : > { %p1961_p7 = pneg %p1960_p1 }
  0xb4   : > { %p1967_p6 = por %p1966_p2, %p1965_p12 }
  0xb6   : > { %p1968_p10 = pnand %p1967_p6, %p1961_p7 }
  0xb8   : > { %1971 = shalt.err (!%p1968_p10)
}
  0xb9   : > { %s1972_s17 = scalar_lea.vmem %s2614_s3, 128  ;;  %s2217_s18 = smov [#allocation10]  }
  0xba   : > { %p1973_p11 = scmp.ne.s32.totalorder %s2614_s3, %s1972_s17  ;;  %s1977_s20 = sshll.u32 %s2217_s18, 4  ;;  %s1978_s20 = int_to_ptr.vmem [resolvable:$false] %s1977_s20 }
  0xbb   : > { %s1979_s9 = scalar_lea.vmem %s1978_s20, 256  ;;  %p1980_p3 = scmp.lt.s32.totalorder %s2614_s3, %s1978_s20 }
  0xbc   : > { %p1975_p13 = pnand %p1973_p11, %p3061_p5  ;;  %p1981_p1 = scmp.lt.s32.totalorder %s1979_s9, %s1972_s17 }
  0xbe   : > { %p1976_p8 = pneg %p1975_p13  ;;  %p1982_p0 = por %p1981_p1, %p1980_p3 }
  0xc0   : > { %p1983_p9 = pnand %p1982_p0, %p1976_p8 }
  0xc2   : > { %1986 = shalt.err (!%p1983_p9)
}
  0xc3   : > { %1678 = dma.hbm_to_vmem [thread:$0]  (!%p2618_p4), %s2612_s23, 128, %s2614_s3, %s2487_s11, %s2213_s0, %s2213_s0, %s2214_s28  }
  0xc4   : > { %s1987_s22 = scalar_lea.hbm %s3025_s1, 64  ;;  %p3104_p12 = scmp.ne.s32.totalorder %s3084_s24, 0 }
  0xc5   : > { %p1988_p7 = scmp.ne.s32.totalorder %s3025_s1, %s1987_s22  ;;  %p1994_p11 = scmp.lt.u32.totalorder %s1987_s22, %s3025_s1 }
  0xc6   : > { %p3105_p2 = pneg %p3104_p12 }
  0xc8   : > { %p1990_p6 = pnand %p1988_p7, %p3105_p2 }
  0xca   : > { %p1991_p10 = pneg %p1990_p6 }
  0xcc   : > { %p1996_p13 = pnand %p1994_p11, %p1991_p10 }
  0xce   : > { %1999 = shalt.err (!%p1996_p13)
}
  0xcf   : > { %s2000_s0 = scalar_lea.vmem %s268_s27, 64  ;;  %p3106_p3 = pmov %p3105_p2 }
  0xd0   : > { %p2001_p8 = scmp.ne.s32.totalorder %s268_s27, %s2000_s0  ;;  %p2008_p9 = scmp.lt.s32.totalorder %s268_s27, %s268_s27 }
  0xd1   : > { %p2009_p5 = scmp.lt.s32.totalorder %s2000_s0, %s2000_s0 }
  0xd2   : > { %p2003_p1 = pnand %p2001_p8, %p3106_p3 }
  0xd3   : > { %p2010_p4 = por %p2009_p5, %p2008_p9 }
  0xd4   : > { %p2004_p0 = pneg %p2003_p1 }
  0xd6   : > { %p2011_p2 = pnand %p2010_p4, %p2004_p0 }
  0xd8   : > { %2014 = shalt.err (!%p2011_p2)
}
  0xd9   : > { %1665 = dma.hbm_to_vmem [thread:$0]  (!%p3104_p12), %s3025_s1, 64, %s268_s27, [#allocation6]  }
  0xda   : > { %s1571_s3 = sshll.u32 %s2203_s13, 8  ;;  %s365_s20 = scalar_lea.vmem [#allocation11], %s2622_s19 }
  0xdb   : > { %s372_s9 = sshll.u32 %s365_s20, 4  ;;  %s2681_s22 = scalar_lea.hbm %s3030_s6, %s1571_s3  ;;  %s2683_s9 = int_to_ptr.vmem [resolvable:$true] %s372_s9 }
  0xdc   : > { %s2015_s24 = scalar_lea.hbm %s2681_s22, 256  ;;  %p3107_p5 = scmp.ne.s32.totalorder %s3103_s29, 0 }
  0xdd   : > { %p2016_p4 = scmp.ne.s32.totalorder %s2681_s22, %s2015_s24  ;;  %s2020_s10 = scalar_lea.hbm %s3030_s6, 512 }
  0xde   : > { %p3108_p7 = pneg %p3107_p5  ;;  %p2021_p10 = scmp.lt.u32.totalorder %s2681_s22, %s3030_s6 }
  0xdf   : > { %p2022_p11 = scmp.lt.u32.totalorder %s2020_s10, %s2015_s24  ;;  %p2024_p8 = scmp.lt.u32.totalorder %s2015_s24, %s2681_s22 }
  0xe0   : > { %p2018_p6 = pnand %p2016_p4, %p3108_p7 }
  0xe1   : > { %p2023_p13 = por %p2022_p11, %p2021_p10 }
  0xe2   : > { %p2019_p12 = pneg %p2018_p6 }
  0xe3   : > { %p2025_p3 = por %p2024_p8, %p2023_p13 }
  0xe5   : > { %p2026_p1 = pnand %p2025_p3, %p2019_p12 }
  0xe7   : > { %2029 = shalt.err (!%p2026_p1)
}
  0xe8   : > { %s2030_s18 = scalar_lea.vmem %s2683_s9, 256  ;;  %p3109_p9 = pmov %p3108_p7 }
  0xe9   : > { %p2031_p0 = scmp.ne.s32.totalorder %s2683_s9, %s2030_s18  ;;  %s2218_s0 = smov [#allocation11]  }
  0xea   : > { %s2035_s28 = sshll.u32 %s2218_s0, 4  ;;  %s2036_s28 = int_to_ptr.vmem [resolvable:$false] %s2035_s28 }
  0xeb   : > { %p2033_p2 = pnand %p2031_p0, %p3109_p9  ;;  %s2037_s23 = scalar_lea.vmem %s2036_s28, 512 }
  0xec   : > { %p2038_p7 = scmp.lt.s32.totalorder %s2683_s9, %s2036_s28  ;;  %p2039_p6 = scmp.lt.s32.totalorder %s2037_s23, %s2030_s18 }
  0xed   : > { %p2034_p4 = pneg %p2033_p2 }
  0xee   : > { %p2040_p10 = por %p2039_p6, %p2038_p7 }
  0xf0   : > { %p2041_p11 = pnand %p2040_p10, %p2034_p4 }
  0xf2   : > { %2044 = shalt.err (!%p2041_p11)
}
  0xf3   : > { %s2219_s3 = smov 8   ;;  %p3110_p12 = scmp.ne.s32.totalorder %s3083_s21, 0 }
  0xf4   : > { %1681 = dma.hbm_to_vmem [thread:$0]  (!%p3107_p5), %s2681_s22, 256, %s2683_s9, %s2487_s11, %s2212_s7, %s2212_s7, %s2219_s3  }
  0xf5   : > { %384 = sbr.rel (%p3110_p12) target bundleno = 858 (0x35a), region = 48  ;;  %p3111_p13 = scmp.eq.s32.totalorder (!%p3110_p12), %s2337_s15, 0 }
  0xfc   : > { %2130 = dma.done.wait (%p3111_p13), [#allocation3], 128   ;;  %p3112_p8 = pmov %p3111_p13 }
  0xfe   : > { %2132 = vsyncadd (%p3112_p8), [#allocation3], 4294967168  ;;  %p3113_p3 = pmov %p3112_p8 }
 0x100   : > { %2134 = dma.done.wait (%p3113_p3), [#allocation6], 64   ;;  %p3114_p1 = pmov %p3113_p3 }
 0x101   : > { %s3115_s29 = sld [smem:[#allocation22_spill]]  ;;  %s3116_s20 = sld [smem:[#allocation33_spill]] }
 0x102   : > { %2136 = vsyncadd (%p3114_p1), [#allocation6], 4294967232  ;;  %s394_s30 = sand.u32 1, %s2337_s15  }
 0x103   : > { %s395_s21 = scalar_lea.sflag [#allocation3], %s394_s30 }
 0x107   : > { %s396_s11 = sand.u32 1, %s3115_s29   ;;  %p3117_p5 = scmp.ne.s32.totalorder %s3116_s20, 0 }
 0x108   : > { %s2723_s7 = sshll.u32 %s396_s11, 2 }
 0x109   : > { %s398_s9 = scalar_lea.vmem [#allocation7], %s2723_s7 }
 0x10a   : > { %2138 = dma.done.wait (%p3117_p5), %s395_s21, 64  }
 0x10b   : > { %2140 = vsyncadd (%p3117_p5), %s395_s21, 4294967232  ;;  %s3118_s2 = sld [smem:[#allocation20_spill]]  ;;  %s3119_s22 = sld [smem:[#allocation26_spill]] }
 0x111   : > { %s2731_s24 = sand.u32 1, %s3118_s2   ;;  %p3120_p0 = scmp.ne.s32.totalorder %s3119_s22, 0 }
 0x112   : > { %s1629_s27 = smul.u32 72, %s2731_s24 }
 0x114   : > { %s2734_s19 = scalar_lea.vmem [#allocation8], %s1629_s27 }
 0x115   : > { %2142 = dma.done.wait (%p3120_p0), %s395_s21, 1536  }
 0x116   : > { %2144 = vsyncadd (%p3120_p0), %s395_s21, 4294965760  ;;  %s3121_s15 = sld [smem:[#allocation27_spill]]  ;;  %s1630_s10 = smul.u32 24, %s2731_s24 }
 0x117   : > { %s423_s16 = sand.u32 1, %s2159_s25  }
 0x118   : > { %s2744_s17 = sshll.u32 %s423_s16, 3  ;;  %s2746_s18 = scalar_lea.vmem [#allocation9], %s1630_s10 }
 0x119   : > { %s425_s0 = scalar_lea.vmem [#allocation10], %s2744_s17 }
 0x11c   : > { %p3122_p9 = scmp.ne.s32.totalorder %s3121_s15, 0 }
 0x11e   : > { %2146 = dma.done.wait (%p3122_p9), %s395_s21, 384  }
 0x11f   : > { %2148 = vsyncadd (%p3122_p9), %s395_s21, 4294966912  ;;  %v2220_v0 = vmov 0   ;;  %v1817_v1 = vld [vmem:[%s2734_s19] sm:$0xff]   ;;  %v1818_v2 = vld [vmem:[%s2734_s19 + $0x8] sm:$0xff]   ;;  %vm565_vm0 = vcmask 130048   ;;  %v2221_v13 = vmov 0.0   ;;  %v696_v29 = vlaneseq }
 0x120   : > { %569 = vmatprep.subr.bf16.mxu0 %v2220_v0  ;;  %v1819_v3 = vld [vmem:[%s2734_s19 + $0x10] sm:$0xff]   ;;  %v1820_v4 = vld [vmem:[%s2734_s19 + $0x18] sm:$0xff]   ;;  %v1821_v7 = vld [vmem:[%s2734_s19 + $0x20] sm:$0xff]   ;;  %1613 = vmatprep.subr.bf16.mxu1 %v2221_v13  ;;  %vm2222_vm1 = vmmov 0   ;;  %vm634_vm2 = vcmask 392192   ;;  %s2773_s28 = sshll.u32 %s423_s16, 4 }
 0x121   : > { %570 = vmatpush1.bf16.msra.mxu0 %v1817_v1  ;;  %v486_v5 = vld [vmem:[#allocation2] sm:$0xff]  ;;  %v1824_v10 = vld [vmem:[%s2734_s19 + $0x38] sm:$0xff]   ;;  %1621 = vmatprep.mubr.msk.bf16.mxu1 %vm2222_vm1, %v2221_v13  ;;  %v1831_v16 = vld [vmem:[%s2746_s18 + $0x10] sm:$0xff]   ;;  %s434_s23 = scalar_lea.vmem [#allocation11], %s2773_s28  ;;  %v2778_v34 = vshrl.u32 %v696_v29, 7  ;;  %s3123_s3 = sld [smem:[#allocation25_spill]] }
 0x122   : > { %571 = vmatprep.subr.bf16.mxu0 %v2220_v0  ;;  %v1529_v6 = vcombine.high %v486_v5, %v486_v5  ;;  %v1822_v8 = vld [vmem:[%s2734_s19 + $0x28] sm:$0xff]   ;;  %v1823_v9 = vld [vmem:[%s2734_s19 + $0x30] sm:$0xff]   ;;  %v1825_v11 = vld [vmem:[%s2734_s19 + $0x40] sm:$0xff]   ;;  %v1528_v12 = vcombine.low %v486_v5, %v486_v5  ;;  %v2223_v53 = vmov 1966171168   ;;  %s3124_s29 = sld [smem:[#allocation24_spill]] }
 0x123   : > { %v1828_v14 = vld [vmem:[%s2746_s18] sm:$0xff]   ;;  %v1830_v15 = vld [vmem:[%s2746_s18 + $0x8] sm:$0xff]   ;;  %v738_v41 = vsub.s32 1, %v2778_v34  ;;  %v764_v54 = vunpack.c.l.s4 %v2223_v53  ;;  %v976_v56 = vsub.s32 3, %v2778_v34  ;;  %v2787_v61 = vadd.s32 8, %v2778_v34  ;;  %s1527_s20 = sshll.u32 %s2731_s24, 4 }
 0x124   : > { %1539 = vmatprep.mubr.msk.bf16.mxu0 %vm565_vm0, %v1529_v6  ;;  %v609_v17 = vld [vmem:[#allocation5] sm:$0xf]  ;;  %v684_v19 = vld [vmem:[%s398_s9] sm:$0xf]  ;;  %v2791_v1 = vsub.s32 0, %v2778_v34  ;;  %s3125_s7 = sld [smem:[#allocation28_spill]] }
 0x125   : > { %572 = vmatpush1.bf16.msra.mxu0 %v1818_v2  ;;  %s484_s21 = scalar_lea.vmem [#allocation12], %s1527_s20  ;;  %s3126_s19 = sld [smem:[#allocation38_spill]] }
 0x126   : > { %573 = vmatprep.subr.bf16.mxu0 %v2220_v0  ;;  %s1316_s9 = sshll.u32 %s484_s21, 4  ;;  %s1302_s10 = scalar_lea.sflag [#allocation4], %s2731_s24  ;;  %s2941_s9 = int_to_ptr.vmem [resolvable:$true] %s1316_s9 }
 0x127   : > { %s1566_s30 = sshll.u32 %s3123_s3, 2  ;;  %s2045_s16 = scalar_lea.vmem %s2941_s9, 256 }
 0x128   : > { %s1313_s11 = sadd.s32 %s3124_s29, %s1566_s30  ;;  %p2046_p2 = scmp.ne.s32.totalorder %s2941_s9, %s2045_s16 }
 0x129   : > { %574 = vmatpush1.bf16.msra.mxu0 %v1819_v3  ;;  %v765_v3 = vunpack.c.0.s8 %v764_v54  ;;  %s1567_s2 = sshll.u32 %s1313_s11, 7  ;;  %s2224_s17 = smov [#allocation12]  }
 0x12a   : > { %575 = vmatprep.subr.bf16.mxu0 %v2220_v0  ;;  %p3127_p4 = scmp.ne.s32.totalorder %s3125_s7, 0  ;;  %s2049_s18 = sshll.u32 %s2224_s17, 4  ;;  %s2050_s18 = int_to_ptr.vmem [resolvable:$false] %s2049_s18 }
 0x12b   : > { %s2946_s15 = scalar_lea.hbm %s3126_s19, %s1567_s2  ;;  %p2052_p10 = scmp.lt.s32.totalorder %s2941_s9, %s2050_s18 }
 0x12c   : > { %p2047_p7 = pnand %p2046_p2, %p3127_p4 }
 0x12d   : > { %576 = vmatpush1.bf16.msra.mxu0 %v1820_v4 }
 0x12e   : > { %577 = vmatprep.subr.bf16.mxu0 %v2220_v0  ;;  %p2048_p6 = pneg %p2047_p7 }
 0x131   : > { %578 = vmatpush1.bf16.msra.mxu0 %v1821_v7 }
 0x132   : > { %579 = vmatprep.subr.bf16.mxu0 %v2220_v0 }
 0x135   : > { %580 = vmatpush1.bf16.msra.mxu0 %v1822_v8 }
 0x136   : > { %581 = vmatprep.subr.bf16.mxu0 %v2220_v0 }
 0x139   : > { %582 = vmatpush1.bf16.msra.mxu0 %v1823_v9 }
 0x13a   : > { %583 = vmatprep.subr.bf16.mxu0 %v2220_v0 }
 0x13d   : > { %584 = vmatpush1.bf16.msra.mxu0 %v1824_v10 }
 0x13e   : > { %585 = vmatprep.subr.bf16.mxu0 %v2220_v0 }
 0x141   : > { %586 = vmatpush1.bf16.msra.mxu0 %v1825_v11 }
 0x142   : > { %1603 = vmatprep.subr.bf16.mxu0 %v2221_v13 }
 0x144   : > { %602 = vmatmul.mubr.bf16.vlgmr.msra.gmra.mrb[0].mxu0 %v1528_v12 }
 0x145   : > { %1604 = vmatpush3.bf16.msra.mxu0 %v1828_v14  ;;  %1609 = vmatprep.mubr.msk.bf16.mxu0 %vm2222_vm1, %v2221_v13 }
 0x146   : > { %1605 = vmatprep.subr.bf16.mxu0 %v2221_v13 }
 0x149   : > { %1606 = vmatpush3.bf16.msra.mxu0 %v1830_v15 }
 0x14a   : > { %1607 = vmatprep.subr.bf16.mxu0 %v2221_v13 }
 0x14d   : > { %1608 = vmatpush3.bf16.msra.mxu0 %v1831_v16  ;;  %v2804_v16 = vsub.s32 2, %v2778_v34 }
 0x150   : > { %1610 = vmatmul.mubr.msk.bf16.vlgmr.msra.gmra.mrb[4].mxu0 %vm634_vm2, %v609_v17 }
 0x217   : > { %v603_v18 = vpop.f32.mrb[0].mxu0 }
 0x218   : > { %v685_v20 = vmul.f32 0.21875, %v603_v18  ;;  %v915_v21 = vmul.f32 0.46875, %v603_v18  ;;  %v605_v22 = vpop.f32.mrb[1].mxu0  ;;  %v2810_v18 = vsub.s32 %v765_v3, %v2778_v34 }
 0x219   : > { %v606_v23 = vpop.f32.mrb[2].mxu0 }
 0x21a   : > { %v686_v24 = vadd.f32 %v685_v20, %v684_v19  ;;  %v916_v25 = vadd.f32 %v915_v21, %v684_v19  ;;  %v607_v26 = vpop.f32.mrb[3].mxu0 }
 0x21c   : > { %v687_v27 = vfloor.f32 %v686_v24  ;;  %v917_v28 = vfloor.f32 %v916_v25 }
 0x21e   : > { %v693_v30 = vmax.f32 %v687_v27, 0.0  ;;  %v713_v31 = vadd.f32 1.0, %v687_v27  ;;  %v923_v33 = vmax.f32 %v917_v28, 0.0  ;;  %v946_v38 = vadd.f32 1.0, %v917_v28 }
 0x21f   : > { %v688_v42 = vsub.f32 %v686_v24, %v687_v27  ;;  %vm690_vm5 = vcmp.ge.f32.partialorder %v687_v27, 0.0  ;;  %vm691_vm6 = vcmp.le.f32.partialorder %v687_v27, 7.0  ;;  %vm920_vm10 = vcmp.ge.f32.partialorder %v917_v28, 0.0 }
 0x220   : > { %v694_v32 = vmin.f32 %v693_v30, 7.0  ;;  %v717_v35 = vmax.f32 %v713_v31, 0.0  ;;  %v924_v36 = vmin.f32 %v923_v33, 15.0  ;;  %vm714_vm3 = vcmp.ge.f32.partialorder %v713_v31, 0.0  ;;  %vm692_vm12 = vmand %vm690_vm5, %vm691_vm6 }
 0x221   : > { %vm715_vm4 = vcmp.le.f32.partialorder %v713_v31, 7.0  ;;  %vm947_vm8 = vcmp.ge.f32.partialorder %v946_v38, 0.0  ;;  %vm948_vm9 = vcmp.le.f32.partialorder %v946_v38, 15.0  ;;  %v950_v45 = vmax.f32 %v946_v38, 0.0 }
 0x222   : > { %v718_v37 = vmin.f32 %v717_v35, 7.0  ;;  %v1631_v39 = vtrunc.f32 %v694_v32  ;;  %v1635_v43 = vtrunc.f32 %v924_v36  ;;  %vm716_vm7 = vmand %vm714_vm3, %vm715_vm4  ;;  %vm921_vm11 = vcmp.le.f32.partialorder %v917_v28, 15.0 }
 0x223   : > { %v918_v48 = vsub.f32 %v916_v25, %v917_v28  ;;  %v1548_v49 = vsel %vm716_vm7, 1.0, %v2221_v13  ;;  %vm949_vm13 = vmand %vm947_vm8, %vm948_vm9  ;;  %v951_v51 = vmin.f32 %v950_v45, 15.0  ;;  %v689_v52 = vsub.f32 1.0, %v688_v42 }
 0x224   : > { %v1633_v40 = vtrunc.f32 %v718_v37  ;;  %v1632_v46 = vcvt.f32.s32 %v1631_v39  ;;  %v1636_v50 = vcvt.f32.s32 %v1635_v43  ;;  %vm922_vm14 = vmand %vm920_vm10, %vm921_vm11  ;;  %v1546_v55 = vsel %vm692_vm12, 1.0, %v2221_v13 }
 0x225   : > { %v729_v58 = vmul.f32 %v1548_v49, %v688_v42  ;;  %v919_v59 = vsub.f32 1.0, %v918_v48  ;;  %v1558_v60 = vsel %vm949_vm13, 1.0, %v2221_v13  ;;  %v1555_v62 = vsel %vm922_vm14, 1.0, %v2221_v13 }
 0x226   : > { %v1634_v44 = vcvt.f32.s32 %v1633_v40  ;;  %v739_v57 = vrot.slane %v1632_v46, %v738_v41  ;;  %v1637_v63 = vtrunc.f32 %v951_v51  ;;  %v977_v0 = vrot.slane %v1636_v50, %v976_v56 }
 0x227   : > { %v707_v2 = vmul.f32 %v1546_v55, %v689_v52  ;;  %v2794_v6 = vmul.f32 %v1558_v60, %v918_v48  ;;  %v758_v8 = vrot.slane %v729_v58, %v738_v41  ;;  %v2798_v9 = vmul.f32 %v1555_v62, %v919_v59 }
 0x228   : > { %v751_v47 = vrot.slane %v1634_v44, %v738_v41  ;;  %v1638_v5 = vcvt.f32.s32 %v1637_v63  ;;  %vm740_vm0 = vcmp.eq.s32.totalorder %v2778_v34, %v739_v57  ;;  %v723_v7 = vrot.slane %v1634_v44, %v2791_v1 }
 0x229   : > { %v701_v10 = vrot.slane %v1632_v46, %v2791_v1  ;;  %vm979_vm1 = vcmp.eq.s32.totalorder %v2787_v61, %v977_v0  ;;  %v1549_v12 = vsel %vm740_vm0, 1.0, %v2221_v13  ;;  %v746_v14 = vrot.slane %v707_v2, %v738_v41 }
 0x22a   : > { %vm752_vm15 = vcmp.eq.s32.totalorder %v2778_v34, %v751_v47  ;;  %v993_v11 = vrot.slane %v1638_v5, %v976_v56  ;;  %v1003_v17 = vrot.slane %v2794_v6, %v976_v56  ;;  %vm724_vm4 = vcmp.eq.s32.totalorder %v2778_v34, %v723_v7 }
 0x22b   : > { %v1550_v4 = vsel %vm752_vm15, 1.0, %v2221_v13  ;;  %v1560_v19 = vsel %vm979_vm1, 1.0, %v2221_v13  ;;  %v747_v21 = vmul.f32 %v1549_v12, %v746_v14  ;;  %vm702_vm5 = vcmp.eq.s32.totalorder %v2778_v34, %v701_v10 }
 0x22c   : > { %v759_v15 = vmul.f32 %v1550_v4, %v758_v8  ;;  %vm994_vm2 = vcmp.eq.s32.totalorder %v2778_v34, %v993_v11  ;;  %vm995_vm3 = vcmp.eq.s32.totalorder %v2787_v61, %v993_v11  ;;  %vm978_vm6 = vcmp.eq.s32.totalorder %v2778_v34, %v977_v0 }
 0x22d   : > { %v1562_v20 = vsel %vm995_vm3, 1.0, %v2221_v13  ;;  %v987_v22 = vrot.slane %v2798_v9, %v976_v56  ;;  %v733_v24 = vrot.slane %v729_v58, %v2791_v1  ;;  %v1561_v25 = vsel %vm994_vm2, 1.0, %v2221_v13 }
 0x22e   : > { %v1005_v23 = vmul.f32 %v1562_v20, %v1003_v17  ;;  %v760_v26 = vadd.f32 %v759_v15, %v747_v21  ;;  %v1547_v27 = vsel %vm724_vm4, 1.0, %v2221_v13  ;;  %v930_v28 = vrot.slane %v1636_v50, %v2804_v16 }
 0x22f   : > { %v956_v29 = vrot.slane %v1638_v5, %v2804_v16  ;;  %v989_v30 = vmul.f32 %v1560_v19, %v987_v22  ;;  %v1545_v31 = vsel %vm702_vm5, 1.0, %v2221_v13  ;;  %v1559_v32 = vsel %vm978_vm6, 1.0, %v2221_v13 }
 0x230   : > { %v762_v33 = vcombine.high %v760_v26, %v760_v26  ;;  %v769_v35 = vrot.slane %v760_v26, %v2810_v18  ;;  %v711_v36 = vrot.slane %v707_v2, %v2791_v1  ;;  %v1004_v37 = vmul.f32 %v1561_v25, %v1003_v17 }
 0x231   : > { %v2827_v38 = vadd.f32 %v1005_v23, %v989_v30  ;;  %v734_v39 = vmul.f32 %v1547_v27, %v733_v24  ;;  %vm931_vm7 = vcmp.eq.s32.totalorder %v2778_v34, %v930_v28  ;;  %vm957_vm8 = vcmp.eq.s32.totalorder %v2778_v34, %v956_v29 }
 0x232   : > { %v777_v40 = vcombine.high %v769_v35, %v769_v35  ;;  %v785_v41 = vrot.slane %v769_v35, %v2810_v18  ;;  %v776_v42 = vrot.slane %v762_v33, %v2810_v18  ;;  %v712_v43 = vmul.f32 %v1545_v31, %v711_v36 }
 0x233   : > { %v988_v44 = vmul.f32 %v1559_v32, %v987_v22  ;;  %vm932_vm9 = vcmp.eq.s32.totalorder %v2787_v61, %v930_v28  ;;  %v1066_v50 = vrot.slane %v2827_v38, %v2810_v18  ;;  %vm958_vm10 = vcmp.eq.s32.totalorder %v2787_v61, %v956_v29 }
 0x234   : > { %v799_v45 = vrot.slane %v777_v40, %v2810_v18  ;;  %v807_v46 = vcombine.high %v785_v41, %v785_v41  ;;  %v814_v47 = vrot.slane %v785_v41, %v2791_v1  ;;  %v778_v48 = vcombine.high %v776_v42, %v776_v42 }
 0x235   : > { %v2836_v49 = vadd.f32 %v1004_v37, %v988_v44  ;;  %v735_v51 = vadd.f32 %v734_v39, %v712_v43  ;;  %v1553_v53 = vsel %vm931_vm7, 1.0, %v2221_v13  ;;  %v1556_v54 = vsel %vm957_vm8, 1.0, %v2221_v13 }
 0x236   : > { %v809_v52 = vcombine.high %v799_v45, %v799_v45  ;;  %v818_v34 = vrot.slane %v799_v45, %v2791_v1  ;;  %v792_v55 = vrot.slane %v776_v42, %v2810_v18  ;;  %v806_v56 = vrot.slane %v778_v48, %v2810_v18 }
 0x237   : > { %v851_v57 = vmul.f32 %v814_v47, %v735_v51  ;;  %v822_v59 = vrot.slane %v807_v46, %v2791_v1  ;;  %v1557_v62 = vsel %vm958_vm10, 1.0, %v2221_v13  ;;  %v969_v63 = vrot.slane %v2794_v6, %v2804_v16 }
 0x238   : > { %v852_v58 = vmul.f32 %v818_v34, %v735_v51  ;;  %v826_v60 = vrot.slane %v809_v52, %v2791_v1  ;;  %v1082_v0 = vrot.slane %v1066_v50, %v2810_v18  ;;  %v1017_v2 = vrot.slane %v2836_v49, %v2810_v18 }
 0x239   : > { %v834_v5 = vrot.slane %v806_v56, %v2791_v1  ;;  %v810_v7 = vcombine.high %v806_v56, %v806_v56  ;;  %v1554_v8 = vsel %vm932_vm9, 1.0, %v2221_v13  ;;  %v943_v10 = vrot.slane %v2798_v9, %v2804_v16 }
 0x23a   : > { %v859_v3 = vpack.c.bf16 %v852_v58, %v851_v57  ;;  %v854_v4 = vmul.f32 %v826_v60, %v735_v51  ;;  %v970_v11 = vmul.f32 %v1556_v54, %v969_v63  ;;  %v1074_v12 = vcombine.high %v1066_v50, %v1066_v50 }
 0x23b   : > { %v971_v6 = vmul.f32 %v1557_v62, %v969_v63  ;;  %v853_v14 = vmul.f32 %v822_v59, %v735_v51  ;;  %v830_v15 = vrot.slane %v792_v55, %v2791_v1  ;;  %v808_v17 = vcombine.high %v792_v55, %v792_v55  ;;  %v1834_v59 = vld [vmem:[%s434_s23 + $0x4] ss:$8 sps:$4 sm:$0xff]  }
 0x23c   : > { %1614 = vmatpush3.bf16.msra.mxu1 %v859_v3  ;;  %v944_v19 = vmul.f32 %v1553_v53, %v943_v10  ;;  %v1143_v20 = vrot.slane %v1082_v0, %v2791_v1  ;;  %v1033_v21 = vrot.slane %v1017_v2, %v2810_v18  ;;  %v1025_v61 = vcombine.high %v1017_v2, %v1017_v2 }
 0x23d   : > { %1615 = vmatprep.subr.bf16.mxu1 %v2221_v13  ;;  %v945_v22 = vmul.f32 %v1554_v8, %v943_v10  ;;  %v860_v23 = vpack.c.bf16 %v854_v4, %v853_v14  ;;  %v856_v24 = vmul.f32 %v834_v5, %v735_v51  ;;  %v842_v9 = vrot.slane %v810_v7, %v2791_v1 }
 0x23e   : > { %v2865_v16 = vadd.f32 %v970_v11, %v944_v19  ;;  %v1096_v25 = vrot.slane %v1074_v12, %v2810_v18  ;;  %v855_v27 = vmul.f32 %v830_v15, %v735_v51  ;;  %v838_v28 = vrot.slane %v808_v17, %v2791_v1 }
 0x23f   : > { %v2868_v26 = vadd.f32 %v971_v6, %v945_v22  ;;  %v1111_v30 = vrot.slane %v1033_v21, %v2791_v1  ;;  %v1047_v31 = vrot.slane %v1025_v61, %v2810_v18  ;;  %v858_v33 = vmul.f32 %v842_v9, %v735_v51 }
 0x240   : > { %1616 = vmatpush3.bf16.msra.mxu1 %v860_v23  ;;  %v1204_v29 = vmul.f32 %v1143_v20, %v2865_v16  ;;  %v861_v32 = vpack.c.bf16 %v856_v24, %v855_v27  ;;  %v1104_v36 = vcombine.high %v1082_v0, %v1082_v0  ;;  %v1147_v37 = vrot.slane %v1096_v25, %v2791_v1 }
 0x241   : > { %1617 = vmatprep.subr.bf16.mxu1 %v2221_v13  ;;  %v1205_v35 = vmul.f32 %v1143_v20, %v2868_v26  ;;  %v1059_v39 = vcombine.high %v2827_v38, %v2827_v38  ;;  %v857_v40 = vmul.f32 %v838_v28, %v735_v51  ;;  %v1188_v41 = vmul.f32 %v1111_v30, %v2865_v16  ;;  %v1829_v38 = vld [vmem:[%s425_s0] sm:$0xff]   ;;  %s2051_s0 = scalar_lea.vmem %s2050_s18, 512 }
 0x242   : > { %v1189_v42 = vmul.f32 %v1111_v30, %v2868_v26  ;;  %v1115_v43 = vrot.slane %v1047_v31, %v2791_v1  ;;  %v1055_v44 = vcombine.high %v1033_v21, %v1033_v21  ;;  %v1010_v45 = vcombine.high %v2836_v49, %v2836_v49  ;;  %p2053_p11 = scmp.lt.s32.totalorder %s2051_s0, %s2045_s16 }
 0x243   : > { %v862_v46 = vpack.c.bf16 %v858_v33, %v857_v40  ;;  %v1228_v47 = vpack.c.bf16 %v1205_v35, %v1204_v29  ;;  %v1151_v48 = vrot.slane %v1104_v36, %v2791_v1  ;;  %v1206_v50 = vmul.f32 %v1147_v37, %v2865_v16 }
 0x244   : > { %1618 = vmatpush3.bf16.msra.mxu1 %v861_v32  ;;  %v1106_v51 = vcombine.high %v1096_v25, %v1096_v25  ;;  %v1073_v52 = vrot.slane %v1059_v39, %v2810_v18  ;;  %vm870_vm11 = vcmask 523264   ;;  %v1220_v34 = vpack.c.bf16 %v1189_v42, %v1188_v41  ;;  %p2054_p12 = por %p2053_p11, %p2052_p10 }
 0x245   : > { %1619 = vmatprep.subr.bf16.mxu1 %v2221_v13  ;;  %v1207_v13 = vmul.f32 %v1147_v37, %v2868_v26  ;;  %v1190_v49 = vmul.f32 %v1115_v43, %v2865_v16  ;;  %v1119_v53 = vrot.slane %v1055_v44, %v2791_v1  ;;  %v1057_v54 = vcombine.high %v1047_v31, %v1047_v31 }
 0x246   : > { %v1191_v55 = vmul.f32 %v1115_v43, %v2868_v26  ;;  %v1208_v56 = vmul.f32 %v1151_v48, %v2865_v16  ;;  %v1209_v57 = vmul.f32 %v1151_v48, %v2868_v26  ;;  %v1024_v58 = vrot.slane %v1010_v45, %v2810_v18  ;;  %p2055_p13 = pnand %p2054_p12, %p2048_p6 }
 0x247   : > { %v1229_v60 = vpack.c.bf16 %v1207_v13, %v1206_v50  ;;  %v1155_v62 = vrot.slane %v1106_v51, %v2791_v1  ;;  %v1089_v63 = vrot.slane %v1073_v52, %v2810_v18  ;;  %v1075_v0 = vcombine.high %v1073_v52, %v1073_v52 }
 0x248   : > { %1620 = vmatpush3.bf16.msra.mxu1 %v862_v46  ;;  %v1192_v2 = vmul.f32 %v1119_v53, %v2865_v16  ;;  %v1193_v3 = vmul.f32 %v1119_v53, %v2868_v26  ;;  %v1123_v4 = vrot.slane %v1057_v54, %v2791_v1  ;;  %v1221_v5 = vpack.c.bf16 %v1191_v55, %v1190_v49  ;;  %v1832_v55 = vld [vmem:[%s434_s23] ss:$8 sps:$4 sm:$0xff]  }
 0x249   : > { %1581 = vmatprep.subr.bf16.mxu1 %v1228_v47  ;;  %v1230_v7 = vpack.c.bf16 %v1209_v57, %v1208_v56  ;;  %v1040_v8 = vrot.slane %v1024_v58, %v2810_v18  ;;  %v1026_v10 = vcombine.high %v1024_v58, %v1024_v58  ;;  %v1210_v11 = vmul.f32 %v1155_v62, %v2865_v16  ;;  %v672_v56 = vpop.f32.mrb[4].mxu0 }
 0x24a   : > { %v1211_v12 = vmul.f32 %v1155_v62, %v2868_v26  ;;  %v1159_v6 = vrot.slane %v1089_v63, %v2791_v1  ;;  %v1103_v14 = vrot.slane %v1075_v0, %v2810_v18  ;;  %v1194_v15 = vmul.f32 %v1123_v4, %v2865_v16  ;;  %v1611_v57 = vpop.f32.mrb[5].mxu0 }
 0x24b   : > { %1622 = vmatmul.mubr.msk.bf16.vlgmr.msra.gmra.mrb[0].mxu1 %vm870_vm11, %v1829_v38  ;;  %v1195_v17 = vmul.f32 %v1123_v4, %v2868_v26  ;;  %v1222_v19 = vpack.c.bf16 %v1193_v3, %v1192_v2  ;;  %v1127_v20 = vrot.slane %v1040_v8, %v2791_v1  ;;  %v1054_v21 = vrot.slane %v1026_v10, %v2810_v18  ;;  %v675_v58 = vpop.f32.mrb[6].mxu0 }
 0x24c   : > { %1582 = vmatpush3.bf16.msra.mxu1 %v1220_v34  ;;  %1280 = vmatprep.mubr.bf16.mxu1 %v1834_v59  ;;  %v1105_v61 = vcombine.high %v1089_v63, %v1089_v63  ;;  %v1231_v22 = vpack.c.bf16 %v1211_v12, %v1210_v11  ;;  %v1212_v23 = vmul.f32 %v1159_v6, %v2865_v16  ;;  %v1612_v59 = vpop.f32.mrb[7].mxu0  ;;  %v1544_v62 = vmul.f32 -1.442695, %v672_v56 }
 0x24d   : > { %1583 = vmatprep.subr.bf16.mxu1 %v1229_v60  ;;  %v1213_v24 = vmul.f32 %v1159_v6, %v2868_v26  ;;  %v1163_v9 = vrot.slane %v1103_v14, %v2791_v1  ;;  %v1223_v25 = vpack.c.bf16 %v1195_v17, %v1194_v15  ;;  %v1056_v27 = vcombine.high %v1040_v8, %v1040_v8 }
 0x24e   : > { %v1196_v28 = vmul.f32 %v1127_v20, %v2865_v16  ;;  %v1197_v29 = vmul.f32 %v1127_v20, %v2868_v26  ;;  %v1131_v30 = vrot.slane %v1054_v21, %v2791_v1  ;;  %v1167_v18 = vrot.slane %v1105_v61, %v2791_v1 }
 0x24f   : > { %v1232_v31 = vpack.c.bf16 %v1213_v24, %v1212_v23  ;;  %v1214_v32 = vmul.f32 %v1163_v9, %v2865_v16  ;;  %v1215_v33 = vmul.f32 %v1163_v9, %v2868_v26  ;;  %v1107_v35 = vcombine.high %v1103_v14, %v1103_v14 }
 0x250   : > { %1584 = vmatpush3.bf16.msra.mxu1 %v1221_v5  ;;  %v1135_v36 = vrot.slane %v1056_v27, %v2791_v1  ;;  %v1224_v37 = vpack.c.bf16 %v1197_v29, %v1196_v28  ;;  %v1198_v39 = vmul.f32 %v1131_v30, %v2865_v16  ;;  %v1199_v40 = vmul.f32 %v1131_v30, %v2868_v26 }
 0x251   : > { %1585 = vmatprep.subr.bf16.mxu1 %v1230_v7  ;;  %v1058_v41 = vcombine.high %v1054_v21, %v1054_v21  ;;  %v1233_v42 = vpack.c.bf16 %v1215_v33, %v1214_v32  ;;  %v1216_v43 = vmul.f32 %v1167_v18, %v2865_v16  ;;  %v1217_v44 = vmul.f32 %v1167_v18, %v2868_v26 }
 0x252   : > { %v1171_v45 = vrot.slane %v1107_v35, %v2791_v1  ;;  %v1225_v46 = vpack.c.bf16 %v1199_v40, %v1198_v39  ;;  %v1200_v47 = vmul.f32 %v1135_v36, %v2865_v16  ;;  %v1201_v48 = vmul.f32 %v1135_v36, %v2868_v26 }
 0x253   : > { %v1139_v38 = vrot.slane %v1058_v41, %v2791_v1  ;;  %v1234_v50 = vpack.c.bf16 %v1217_v44, %v1216_v43  ;;  %1835 = vpow2.f32 %v1544_v62 }
 0x254   : > { %1586 = vmatpush3.bf16.msra.mxu1 %v1222_v19  ;;  %v1218_v13 = vmul.f32 %v1171_v45, %v2865_v16  ;;  %v1219_v51 = vmul.f32 %v1171_v45, %v2868_v26  ;;  %v1226_v52 = vpack.c.bf16 %v1201_v48, %v1200_v47 }
 0x255   : > { %1587 = vmatprep.subr.bf16.mxu1 %v1231_v22  ;;  %v1202_v34 = vmul.f32 %v1139_v38, %v2865_v16  ;;  %v1203_v49 = vmul.f32 %v1139_v38, %v2868_v26 }
 0x256   : > { %v1235_v53 = vpack.c.bf16 %v1219_v51, %v1218_v13 }
 0x257   : > { %v1227_v54 = vpack.c.bf16 %v1203_v49, %v1202_v34 }
 0x258   : > { %1588 = vmatpush3.bf16.msra.mxu1 %v1223_v25 }
 0x259   : > { %1589 = vmatprep.subr.bf16.mxu1 %v1232_v31 }
 0x25c   : > { %1590 = vmatpush3.bf16.msra.mxu1 %v1224_v37 }
 0x25d   : > { %1591 = vmatprep.subr.bf16.mxu1 %v1233_v42  ;;  %v1836_v26 = vpop.eup %1835 }
 0x25e   : > { %v681_v2 = vadd.f32 1.0, %v1836_v26 }
 0x260   : > { %1592 = vmatpush3.bf16.msra.mxu1 %v1225_v46  ;;  %1837 = vrcp.f32 %v681_v2 }
 0x261   : > { %1593 = vmatprep.subr.bf16.mxu1 %v1234_v50 }
 0x264   : > { %1594 = vmatpush3.bf16.msra.mxu1 %v1226_v52 }
 0x265   : > { %1595 = vmatprep.subr.bf16.mxu1 %v1235_v53 }
 0x268   : > { %1596 = vmatpush3.bf16.msra.mxu1 %v1227_v54 }
 0x26a   : > { %v1838_v3 = vpop.eup %1837 }
 0x26b   : > { %1281 = vmatmul.mubr.bf16.vlgmr.msra.gmra.mrb[4].mxu1 %v1832_v55  ;;  %v1294_v8 = vrot.slane %v1838_v3, %v2791_v1 }
 0x31e   : > { %v908_v60 = vpop.f32.mrb[0].mxu1 }
 0x31f   : > { %v1623_v63 = vpop.f32.mrb[1].mxu1 }
 0x320   : > { %v911_v16 = vpop.f32.mrb[2].mxu1 }
 0x321   : > { %v1624_v0 = vpop.f32.mrb[3].mxu1 }
 0x33e   : > { %v1597_v4 = vpop.f32.mrb[4].mxu1 }
 0x33f   : > { %v1598_v5 = vpop.f32.mrb[5].mxu1 }
 0x340   : > { %v1599_v7 = vadd.f32 %v1598_v5, %v1597_v4  ;;  %v1600_v10 = vpop.f32.mrb[6].mxu1 }
 0x341   : > { %v1601_v11 = vpop.f32.mrb[7].mxu1 }
 0x342   : > { %v1289_v12 = vsub.f32 %v908_v60, %v1599_v7  ;;  %v1602_v6 = vadd.f32 %v1601_v11, %v1600_v10 }
 0x344   : > { %v1295_v14 = vmul.f32 %v1294_v8, %v1289_v12  ;;  %v1290_v15 = vsub.f32 %v911_v16, %v1602_v6 }
 0x346   : > { %v1297_v17 = vadd.f32 %v1599_v7, %v1295_v14  ;;  %v1296_v19 = vmul.f32 %v1294_v8, %v1290_v15 }
 0x348   : > { %1299 = vst [vmem:[%s484_s21] sm:$0xff] %v1297_v17  ;;  %v1298_v1 = vadd.f32 %v1602_v6, %v1296_v19 }
 0x34a   : > { %1300 = vst [vmem:[%s484_s21 + $0x8] sm:$0xff] %v1298_v1 }
 0x34b   : > { %2058 = shalt.err (!%p2055_p13)
}
 0x34c   : > { %s2059_s28 = scalar_lea.hbm %s2946_s15, 256  ;;  %s2063_s29 = scalar_lea.hbm %s3126_s19, 1024 }
 0x34d   : > { %p2060_p8 = scmp.ne.s32.totalorder %s2946_s15, %s2059_s28  ;;  %p2064_p5 = scmp.lt.u32.totalorder %s2946_s15, %s3126_s19 }
 0x34e   : > { %p2065_p0 = scmp.lt.u32.totalorder %s2063_s29, %s2059_s28  ;;  %p2067_p2 = scmp.lt.u32.totalorder %s2059_s28, %s2946_s15 }
 0x34f   : > { %p2061_p3 = pnand %p2060_p8, %p3127_p4 }
 0x350   : > { %p2066_p9 = por %p2065_p0, %p2064_p5 }
 0x351   : > { %p2062_p1 = pneg %p2061_p3 }
 0x352   : > { %p2068_p7 = por %p2067_p2, %p2066_p9 }
 0x354   : > { %p2069_p6 = pnand %p2068_p7, %p2062_p1 }
 0x356   : > { %2072 = shalt.err (!%p2069_p6)
}
 0x357   : > { %s2225_s11 = smov 128   ;;  %s2226_s21 = smov 256  }
 0x358   : > { %s2227_s2 = smov 8  }
 0x359   : > { %1657 = dma.vmem_to_hbm [thread:$0]  (%p3127_p4), %s2941_s9, 256, %s2946_s15, %s1302_s10, %s2225_s11, %s2226_s21, %s2227_s2  }
 0x35a PF: > { %s3128_s22 = sld [smem:[#allocation19_spill]]  ;;  %s3129_s27 = sld [smem:[#allocation29_spill]] }
 0x35b   : > { %p1691_p10 = scmp.ge.s32.totalorder %s2207_s14, 2 }
 0x360   : > { %s1331_s16 = sand.u32 1, %s3128_s22   ;;  %p3130_p11 = scmp.ne.s32.totalorder %s3129_s27, 0 }
 0x361   : > { %s1332_s17 = scalar_lea.sflag [#allocation4], %s1331_s16 }
 0x362   : > { %p1683_p12 = pnand %p1691_p10, %p3130_p11 }
 0x364   : > { %2150 = dma.done.wait (!%p1683_p12), %s1332_s17, 256  }
 0x365   : > { %2152 = vsyncadd (!%p1683_p12), %s1332_s17, 4294967040  ;;  %s22_s14 = sadd.s32 1, %s2207_s14   ;;  %s3132_s27 = sld [smem:[#allocation20_spill]] }
 0x366   : > { %p2977_p13 = scmp.ge.s32.totalorder %s22_s14, 6   ;;  %s3133_s28 = sld [smem:[#allocation21_spill]] }
 0x367   : > { %s3134_s29 = sld [smem:[#allocation34_spill]]  ;;  %s3135_s30 = sld [smem:[#allocation22_spill]] }
 0x368   : > { %s3136_s7 = sld [smem:[#allocation23_spill]]  ;;  %s3137_s9 = sld [smem:[#allocation32_spill]] }
 0x369   : > { %s3138_s15 = sld [smem:[#allocation30_spill]]  ;;  %s3139_s0 = sld [smem:[#allocation31_spill]] }
 0x36a   : > { %s3140_s24 = smov %s2159_s25  ;;  %s3141_s25 = smov %s2163_s26 }
 0x36b   : > { %s3142_s26 = smov %s2601_s8  ;;  %s3144_s10 = smov %s2199_s12 }
 0x36c   : > { %s3145_s11 = smov %s2203_s13  ;;  %21 = sbr.rel (!%p2977_p13) target bundleno = 15 (0xf), region = 144 }
 0x36e   : > { %s3143_s8 = smov %s3136_s7 }
 0x36f   : > { %s3146_s12 = smov %s3138_s15  ;;  %s3147_s13 = smov %s3139_s0 }
 0x373   :  { %1337 = vsyncpa [#allocation3], 1 }
 0x374   :  { %1339 = vsyncpa [#allocation3 + $0x1], 1 }
 0x375   :  { %1340 = vsyncpa [#allocation6], 1 }
 0x376   :  { %1341 = vsyncpa [#allocation4], 1 }
 0x377   :  { %1343 = vsyncpa [#allocation4 + $0x1], 1 }

</bundles_post_ra>
